<compile_context>
chip_gen: v7x
topology: tpu7x:2x2x1
jax: 0.10.0
libtpu: 0.0.40
codegen_flags: <defaults>
</compile_context>

<pallas_src>
import functools

import numpy as np

import jax
import jax.numpy as jnp
from jax.experimental import pallas as pl
from jax.experimental.pallas import tpu as pltpu


# ----------------------------------------------------------------------------
# Host-side constants (cached; built once per (batch, length) combination)
# ----------------------------------------------------------------------------
@functools.lru_cache(maxsize=None)
def _conv_structure(batch, length, time_major_out):
    """Sequence-boundary masks (not-first / not-last row) and the even-row
    maxpool compaction / reorder matrix for a batch-folded (batch*length, C)
    activation layout."""
    n = batch * length
    half = length // 2
    nf = np.ones((n, 1), np.float32)   # 0 where l == 0        (left zero pad)
    nl = np.ones((n, 1), np.float32)   # 0 where l == length-1 (right zero pad)
    se = np.zeros((batch * half, n), np.float32)
    for b in range(batch):
        nf[b * length, 0] = 0.0
        nl[b * length + length - 1, 0] = 0.0
        for q in range(half):
            p = q * batch + b if time_major_out else b * half + q
            se[p, b * length + 2 * q] = 1.0      # keep even row of each pool pair
    return nf, nl, se


def _pack_slab(named):
    """Pack (name, 2-D array with <=128 cols) pairs into one (R, 128) f32 slab.
    Row offsets are 8-aligned so in-kernel static slices are cheap."""
    offsets = {}
    rows = 0
    for name, a in named:
        a = np.asarray(a, np.float32)
        assert a.ndim == 2 and a.shape[1] <= 128, (name, a.shape)
        offsets[name] = (rows, a.shape[0], a.shape[1])
        rows += ((a.shape[0] + 7) // 8) * 8
    slab = np.zeros((max(rows, 8), 128), np.float32)
    for name, a in named:
        off, r, c = offsets[name]
        slab[off:off + r, :c] = np.asarray(a, np.float32)
    return slab, offsets


# ----------------------------------------------------------------------------
# The fused kernel
# ----------------------------------------------------------------------------
def _build_kernel(offsets, *, B, H, T, num_layers):
    f32, bf16 = jnp.float32, jnp.bfloat16

    def kernel(x_ref, slab_ref, o_ref, hbuf_ref):
        def take(name):                          # static slice of the packed slab
            off, r, c = offsets[name]
            return slab_ref[off:off + r, :c]

        def dot(a, b):                           # bf16 operands, f32 accumulate
            return jnp.dot(a.astype(bf16), b.astype(bf16),
                           preferred_element_type=f32)

        # ---- Conv1d(k=3, pad=1) + ReLU + MaxPool1d(2), batch folded into rows ----
        def conv_relu_pool(h, tag):
            n = h.shape[0]
            # Per-tap projections first (3 back-to-back MXU ops), then shift the
            # projected results with XLU sublane rolls + boundary masks (zero pad).
            p0 = dot(h, take(f"w{tag}_0"))
            p1 = dot(h, take(f"w{tag}_1"))
            p2 = dot(h, take(f"w{tag}_2"))
            y = (take(f"nf{tag}") * pltpu.roll(p0, shift=1, axis=0)        # x[l-1] tap
                 + p1                                                       # x[l]   tap
                 + take(f"nl{tag}") * pltpu.roll(p2, shift=n - 1, axis=0)   # x[l+1] tap
                 + take(f"b{tag}"))
            y = jnp.maximum(y, 0.0)                                         # ReLU
            # MaxPool1d(2): pairwise max (valid at even rows), then one even-row
            # compaction + reorder matmul.
            y = jnp.maximum(y, pltpu.roll(y, shift=n - 1, axis=0))
            return dot(take(f"se{tag}"), y)

        h1 = conv_relu_pool(x_ref[...], "1")     # (B*S/2, 64)  batch-major
        xin = conv_relu_pool(h1, "2")            # (T*B, 128)   time-major
        # Dropout(p=0.5) is identity in eval mode.
        # TODO(synk): training-mode dropout (p=0.5) is not implemented.

        # ---- multi-layer LSTM: fused gates, time-batched input projection ----
        h = None
        for layer in range(num_layers):
            wih = take(f"wih{layer}").astype(bf16)   # (In, 4H), cast once
            whh = take(f"whh{layer}").astype(bf16)   # (H, 4H),  cast once
            bl = take(f"bl{layer}")                  # (1, 4H)   f32
            # Input projection hoisted out of the recurrence, batched across time.
            inp = xin if layer == 0 else hbuf_ref[...]       # (T*B, In) time-major
            gp = dot(inp, wih) + bl                          # (T*B, 4H)
            h = jnp.zeros((B, H), f32)
            c = jnp.zeros((B, H), f32)
            for t in range(T):                   # statically unrolled; T is tiny
                g = gp[t * B:(t + 1) * B, :] + dot(h, whh)   # (B,4H) [i|f|g|o]
                sg = jax.nn.sigmoid(g)           # one EUP pass covers i, f, o
                gg = jnp.tanh(g[:, 2 * H:3 * H])
                c = sg[:, H:2 * H] * c + sg[:, 0:H] * gg     # f32 elementwise
                h = sg[:, 3 * H:4 * H] * jnp.tanh(c)
                if layer + 1 < num_layers:       # stash h_t for the next layer
                    hbuf_ref[t * B:(t + 1) * B, :] = h

        # ---- fused head on the last timestep: fc1 -> ReLU -> fc2 ----
        hid = jnp.maximum(dot(h, take("wf1")) + take("bf1"), 0.0)
        o_ref[...] = (dot(hid, take("wf2")) + take("bf2")).astype(o_ref.dtype)

    return kernel


# ----------------------------------------------------------------------------
# Builder: packs constants once, returns a jitted forward(x)
# ----------------------------------------------------------------------------
def make_forward(params, batch, seq_len):
    cin = params["w_conv1"].shape[1]
    hidden = params["lstm"][0][1].shape[0]
    num_layers = len(params["lstm"])
    out_dim = params["w_fc2"].shape[1]
    assert seq_len % 4 == 0, "two MaxPool1d(2) stages need seq_len % 4 == 0"
    assert batch * seq_len <= 128 and 4 * hidden <= 128, \
        "slab packing assumes <=128 columns per packed array"
    T = seq_len // 4

    nf1, nl1, se1 = _conv_structure(batch, seq_len, False)
    nf2, nl2, se2 = _conv_structure(batch, seq_len // 2, True)

    named = [
        ("nf1", nf1), ("nl1", nl1), ("se1", se1),
        ("nf2", nf2), ("nl2", nl2), ("se2", se2),
        ("w1_0", params["w_conv1"][0]), ("w1_1", params["w_conv1"][1]),
        ("w1_2", params["w_conv1"][2]), ("b1", params["b_conv1"]),
        ("w2_0", params["w_conv2"][0]), ("w2_1", params["w_conv2"][1]),
        ("w2_2", params["w_conv2"][2]), ("b2", params["b_conv2"]),
    ]
    for i, (wih, whh, b) in enumerate(params["lstm"]):
        named += [(f"wih{i}", wih), (f"whh{i}", whh), (f"bl{i}", b)]
    named += [("wf1", params["w_fc1"]), ("bf1", params["b_fc1"]),
              ("wf2", params["w_fc2"]), ("bf2", params["b_fc2"])]

    slab_np, offsets = _pack_slab(named)
    slab = jnp.asarray(slab_np)                  # device-resident, reused every call

    kernel = _build_kernel(offsets, B=batch, H=hidden, T=T, num_layers=num_layers)
    vmem = pl.BlockSpec(memory_space=pltpu.MemorySpace.VMEM)

    call = pl.pallas_call(
        kernel,
        out_shape=jax.ShapeDtypeStruct((batch, out_dim), jnp.float32),
        in_specs=[vmem, vmem],
        out_specs=vmem,
        scratch_shapes=[pltpu.VMEM((T * batch, hidden), jnp.float32)],
    )

    @jax.jit
    def _fwd(x, slab_arg):
        return call(x.reshape(batch * seq_len, cin), slab_arg)

    return lambda x: _fwd(x, slab)


# ----------------------------------------------------------------------------
# Pure-JAX f32 reference (same weights / same math) for correctness check
# ----------------------------------------------------------------------------
def ref_forward(x, params):
    def conv_pool(h, w, b):
        _, L, _ = h.shape
        hp = jnp.pad(h, ((0, 0), (1, 1), (0, 0)))
        y = (jnp.einsum("blc,cd->bld", hp[:, 0:L], w[0])
             + jnp.einsum("blc,cd->bld", hp[:, 1:L + 1], w[1])
             + jnp.einsum("blc,cd->bld", hp[:, 2:L + 2], w[2]) + b)
        y = jnp.maximum(y, 0.0)
        return jnp.maximum(y[:, 0::2], y[:, 1::2])

    h = conv_pool(x, params["w_conv1"], params["b_conv1"])
    h = conv_pool(h, params["w_conv2"], params["b_conv2"])
    B, T, _ = h.shape
    for (wih, whh, b) in params["lstm"]:
        H = whh.shape[0]
        hh = jnp.zeros((B, H), jnp.float32)
        cc = jnp.zeros((B, H), jnp.float32)
        hs = []
        for t in range(T):
            g = h[:, t, :] @ wih + hh @ whh + b
            i = jax.nn.sigmoid(g[:, 0:H])
            f = jax.nn.sigmoid(g[:, H:2 * H])
            gg = jnp.tanh(g[:, 2 * H:3 * H])
            o = jax.nn.sigmoid(g[:, 3 * H:4 * H])
            cc = f * cc + i * gg
            hh = o * jnp.tanh(cc)
            hs.append(hh)
        h = jnp.stack(hs, axis=1)
    last = h[:, -1, :]
    hid = jnp.maximum(last @ params["w_fc1"] + params["b_fc1"], 0.0)
    return hid @ params["w_fc2"] + params["b_fc2"]


# ----------------------------------------------------------------------------
# Deterministic parameter initialization (shapes from the torch __init__)
# ----------------------------------------------------------------------------
def init_params(key, input_size, hidden_size, num_layers, output_size):
    def nrm(k, shape, scale=0.1):
        return scale * jax.random.normal(k, shape, jnp.float32)

    keys = iter(jax.random.split(key, 8 + 3 * num_layers))
    params = {
        "w_conv1": nrm(next(keys), (3, input_size, 64)),
        "b_conv1": nrm(next(keys), (1, 64)),
        "w_conv2": nrm(next(keys), (3, 64, 128)),
        "b_conv2": nrm(next(keys), (1, 128)),
        "w_fc1": nrm(next(keys), (hidden_size, 64)),
        "b_fc1": nrm(next(keys), (1, 64)),
        "w_fc2": nrm(next(keys), (64, output_size)),
        "b_fc2": nrm(next(keys), (1, output_size)),
        "lstm": [],
    }
    in_size = 128
    for _ in range(num_layers):
        wih = nrm(next(keys), (in_size, 4 * hidden_size))     # gate-fused [i|f|g|o]
        whh = nrm(next(keys), (hidden_size, 4 * hidden_size))
        b = nrm(next(keys), (1, 4 * hidden_size))             # b_ih + b_hh combined
        params["lstm"].append((wih, whh, b))
        in_size = hidden_size
    return params


if __name__ == "__main__":
    B, S, input_size = 2, 16, 4
    hidden_size, num_layers, output_size = 32, 2, 1

    key = jax.random.PRNGKey(0)
    k_params, k_x = jax.random.split(key)
    params = init_params(k_params, input_size, hidden_size, num_layers, output_size)
    x = jax.random.normal(k_x, (B, S, input_size), jnp.float32)

    fwd = make_forward(params, B, S)
    out = jax.block_until_ready(fwd(x))
    ref = jax.block_until_ready(ref_forward(x, params))

    assert out.shape == (B, output_size), out.shape
    # bf16 matmul operands (f32 accumulation) vs. an all-f32 reference.
    assert jnp.allclose(out, ref, atol=2e-2, rtol=2e-2), (out, ref)
    print("KERNEL_OK")
</pallas_src>

<mosaic_0001>
module attributes {stable_mosaic.version = 11 : i64} {
  func.func @kernel(%arg0: memref<32x4xf32, #tpu.memory_space<vmem>>, %arg1: memref<704x128xf32, #tpu.memory_space<vmem>>, %arg2: memref<2x1xf32, #tpu.memory_space<vmem>>, %arg3: memref<8x32xf32, #tpu.memory_space<vmem>>) attributes {dimension_semantics = [], scalar_prefetch = 0 : i64, scratch_operands = 1 : i64, tpu.core_type = #tpu.core_type<tc>} {
    %c0 = arith.constant 0 : index
    %c0_0 = arith.constant 0 : index
    %0 = vector.load %arg0[%c0, %c0_0] : memref<32x4xf32, #tpu.memory_space<vmem>>, vector<32x4xf32>
    %c120 = arith.constant 120 : index
    %c0_1 = arith.constant 0 : index
    %1 = vector.load %arg1[%c120, %c0_1] : memref<704x128xf32, #tpu.memory_space<vmem>>, vector<4x64xf32>
    %2 = arith.truncf %0 : vector<32x4xf32> to vector<32x4xbf16>
    %3 = arith.truncf %1 : vector<4x64xf32> to vector<4x64xbf16>
    %cst = arith.constant dense<0.000000e+00> : vector<32x64xf32>
    %4 = tpu.matmul %2, %3, %cst {dimension_numbers = #tpu.dot_dimension_numbers<[1], [0], [0], [1], [0, 0, 1, 1], [], []>} : vector<32x4xbf16>, vector<4x64xbf16>, vector<32x64xf32> -> vector<32x64xf32>
    %c128 = arith.constant 128 : index
    %c0_2 = arith.constant 0 : index
    %5 = vector.load %arg1[%c128, %c0_2] : memref<704x128xf32, #tpu.memory_space<vmem>>, vector<4x64xf32>
    %6 = arith.truncf %0 : vector<32x4xf32> to vector<32x4xbf16>
    %7 = arith.truncf %5 : vector<4x64xf32> to vector<4x64xbf16>
    %cst_3 = arith.constant dense<0.000000e+00> : vector<32x64xf32>
    %8 = tpu.matmul %6, %7, %cst_3 {dimension_numbers = #tpu.dot_dimension_numbers<[1], [0], [0], [1], [0, 0, 1, 1], [], []>} : vector<32x4xbf16>, vector<4x64xbf16>, vector<32x64xf32> -> vector<32x64xf32>
    %c136 = arith.constant 136 : index
    %c0_4 = arith.constant 0 : index
    %9 = vector.load %arg1[%c136, %c0_4] : memref<704x128xf32, #tpu.memory_space<vmem>>, vector<4x64xf32>
    %10 = arith.truncf %0 : vector<32x4xf32> to vector<32x4xbf16>
    %11 = arith.truncf %9 : vector<4x64xf32> to vector<4x64xbf16>
    %cst_5 = arith.constant dense<0.000000e+00> : vector<32x64xf32>
    %12 = tpu.matmul %10, %11, %cst_5 {dimension_numbers = #tpu.dot_dimension_numbers<[1], [0], [0], [1], [0, 0, 1, 1], [], []>} : vector<32x4xbf16>, vector<4x64xbf16>, vector<32x64xf32> -> vector<32x64xf32>
    %c0_6 = arith.constant 0 : index
    %c0_7 = arith.constant 0 : index
    %13 = vector.load %arg1[%c0_6, %c0_7] : memref<704x128xf32, #tpu.memory_space<vmem>>, vector<32x1xf32>
    %c1_i32 = arith.constant 1 : i32
    %14 = tpu.dynamic_rotate %4 by %c1_i32 dim 0 : vector<32x64xf32>, i32 -> vector<32x64xf32>
    %15 = vector.broadcast %13 : vector<32x1xf32> to vector<32x64xf32>
    %16 = arith.mulf %15, %14 : vector<32x64xf32>
    %17 = arith.addf %16, %8 : vector<32x64xf32>
    %c32 = arith.constant 32 : index
    %c0_8 = arith.constant 0 : index
    %18 = vector.load %arg1[%c32, %c0_8] : memref<704x128xf32, #tpu.memory_space<vmem>>, vector<32x1xf32>
    %c31_i32 = arith.constant 31 : i32
    %19 = tpu.dynamic_rotate %12 by %c31_i32 dim 0 : vector<32x64xf32>, i32 -> vector<32x64xf32>
    %20 = vector.broadcast %18 : vector<32x1xf32> to vector<32x64xf32>
    %21 = arith.mulf %20, %19 : vector<32x64xf32>
    %22 = arith.addf %17, %21 : vector<32x64xf32>
    %c144 = arith.constant 144 : index
    %c0_9 = arith.constant 0 : index
    %23 = vector.load %arg1[%c144, %c0_9] : memref<704x128xf32, #tpu.memory_space<vmem>>, vector<1x64xf32>
    %24 = vector.broadcast %23 : vector<1x64xf32> to vector<32x64xf32>
    %25 = arith.addf %22, %24 : vector<32x64xf32>
    %cst_10 = arith.constant 0.000000e+00 : f32
    %26 = vector.broadcast %cst_10 : f32 to vector<32x64xf32>
    %27 = arith.maximumf %25, %26 : vector<32x64xf32>
    %c31_i32_11 = arith.constant 31 : i32
    %28 = tpu.dynamic_rotate %27 by %c31_i32_11 dim 0 : vector<32x64xf32>, i32 -> vector<32x64xf32>
    %29 = arith.maximumf %27, %28 : vector<32x64xf32>
    %c64 = arith.constant 64 : index
    %c0_12 = arith.constant 0 : index
    %30 = vector.load %arg1[%c64, %c0_12] : memref<704x128xf32, #tpu.memory_space<vmem>>, vector<16x32xf32>
    %31 = arith.truncf %30 : vector<16x32xf32> to vector<16x32xbf16>
    %32 = arith.truncf %29 : vector<32x64xf32> to vector<32x64xbf16>
    %cst_13 = arith.constant dense<0.000000e+00> : vector<16x64xf32>
    %33 = tpu.matmul %31, %32, %cst_13 {dimension_numbers = #tpu.dot_dimension_numbers<[1], [0], [0], [1], [0, 0, 1, 1], [], []>} : vector<16x32xbf16>, vector<32x64xbf16>, vector<16x64xf32> -> vector<16x64xf32>
    %c152 = arith.constant 152 : index
    %c0_14 = arith.constant 0 : index
    %34 = vector.load %arg1[%c152, %c0_14] : memref<704x128xf32, #tpu.memory_space<vmem>>, vector<64x128xf32>
    %35 = arith.truncf %33 : vector<16x64xf32> to vector<16x64xbf16>
    %36 = arith.truncf %34 : vector<64x128xf32> to vector<64x128xbf16>
    %cst_15 = arith.constant dense<0.000000e+00> : vector<16x128xf32>
    %37 = tpu.matmul %35, %36, %cst_15 {dimension_numbers = #tpu.dot_dimension_numbers<[1], [0], [0], [1], [0, 0, 1, 1], [], []>} : vector<16x64xbf16>, vector<64x128xbf16>, vector<16x128xf32> -> vector<16x128xf32>
    %c216 = arith.constant 216 : index
    %c0_16 = arith.constant 0 : index
    %38 = vector.load %arg1[%c216, %c0_16] : memref<704x128xf32, #tpu.memory_space<vmem>>, vector<64x128xf32>
    %39 = arith.truncf %33 : vector<16x64xf32> to vector<16x64xbf16>
    %40 = arith.truncf %38 : vector<64x128xf32> to vector<64x128xbf16>
    %cst_17 = arith.constant dense<0.000000e+00> : vector<16x128xf32>
    %41 = tpu.matmul %39, %40, %cst_17 {dimension_numbers = #tpu.dot_dimension_numbers<[1], [0], [0], [1], [0, 0, 1, 1], [], []>} : vector<16x64xbf16>, vector<64x128xbf16>, vector<16x128xf32> -> vector<16x128xf32>
    %c280 = arith.constant 280 : index
    %c0_18 = arith.constant 0 : index
    %42 = vector.load %arg1[%c280, %c0_18] : memref<704x128xf32, #tpu.memory_space<vmem>>, vector<64x128xf32>
    %43 = arith.truncf %33 : vector<16x64xf32> to vector<16x64xbf16>
    %44 = arith.truncf %42 : vector<64x128xf32> to vector<64x128xbf16>
    %cst_19 = arith.constant dense<0.000000e+00> : vector<16x128xf32>
    %45 = tpu.matmul %43, %44, %cst_19 {dimension_numbers = #tpu.dot_dimension_numbers<[1], [0], [0], [1], [0, 0, 1, 1], [], []>} : vector<16x64xbf16>, vector<64x128xbf16>, vector<16x128xf32> -> vector<16x128xf32>
    %c80 = arith.constant 80 : index
    %c0_20 = arith.constant 0 : index
    %46 = vector.load %arg1[%c80, %c0_20] : memref<704x128xf32, #tpu.memory_space<vmem>>, vector<16x1xf32>
    %c1_i32_21 = arith.constant 1 : i32
    %47 = tpu.dynamic_rotate %37 by %c1_i32_21 dim 0 : vector<16x128xf32>, i32 -> vector<16x128xf32>
    %48 = vector.broadcast %46 : vector<16x1xf32> to vector<16x128xf32>
    %49 = arith.mulf %48, %47 : vector<16x128xf32>
    %50 = arith.addf %49, %41 : vector<16x128xf32>
    %c96 = arith.constant 96 : index
    %c0_22 = arith.constant 0 : index
    %51 = vector.load %arg1[%c96, %c0_22] : memref<704x128xf32, #tpu.memory_space<vmem>>, vector<16x1xf32>
    %c15_i32 = arith.constant 15 : i32
    %52 = tpu.dynamic_rotate %45 by %c15_i32 dim 0 : vector<16x128xf32>, i32 -> vector<16x128xf32>
    %53 = vector.broadcast %51 : vector<16x1xf32> to vector<16x128xf32>
    %54 = arith.mulf %53, %52 : vector<16x128xf32>
    %55 = arith.addf %50, %54 : vector<16x128xf32>
    %c344 = arith.constant 344 : index
    %c0_23 = arith.constant 0 : index
    %56 = vector.load %arg1[%c344, %c0_23] : memref<704x128xf32, #tpu.memory_space<vmem>>, vector<1x128xf32>
    %57 = vector.broadcast %56 : vector<1x128xf32> to vector<16x128xf32>
    %58 = arith.addf %55, %57 : vector<16x128xf32>
    %cst_24 = arith.constant 0.000000e+00 : f32
    %59 = vector.broadcast %cst_24 : f32 to vector<16x128xf32>
    %60 = arith.maximumf %58, %59 : vector<16x128xf32>
    %c15_i32_25 = arith.constant 15 : i32
    %61 = tpu.dynamic_rotate %60 by %c15_i32_25 dim 0 : vector<16x128xf32>, i32 -> vector<16x128xf32>
    %62 = arith.maximumf %60, %61 : vector<16x128xf32>
    %c112 = arith.constant 112 : index
    %c0_26 = arith.constant 0 : index
    %63 = vector.load %arg1[%c112, %c0_26] : memref<704x128xf32, #tpu.memory_space<vmem>>, vector<8x16xf32>
    %64 = arith.truncf %63 : vector<8x16xf32> to vector<8x16xbf16>
    %65 = arith.truncf %62 : vector<16x128xf32> to vector<16x128xbf16>
    %cst_27 = arith.constant dense<0.000000e+00> : vector<8x128xf32>
    %66 = tpu.matmul %64, %65, %cst_27 {dimension_numbers = #tpu.dot_dimension_numbers<[1], [0], [0], [1], [0, 0, 1, 1], [], []>} : vector<8x16xbf16>, vector<16x128xbf16>, vector<8x128xf32> -> vector<8x128xf32>
    %c352 = arith.constant 352 : index
    %c0_28 = arith.constant 0 : index
    %67 = vector.load %arg1[%c352, %c0_28] : memref<704x128xf32, #tpu.memory_space<vmem>>, vector<128x128xf32>
    %68 = arith.truncf %67 : vector<128x128xf32> to vector<128x128xbf16>
    %c480 = arith.constant 480 : index
    %c0_29 = arith.constant 0 : index
    %69 = vector.load %arg1[%c480, %c0_29] : memref<704x128xf32, #tpu.memory_space<vmem>>, vector<32x128xf32>
    %70 = arith.truncf %69 : vector<32x128xf32> to vector<32x128xbf16>
    %c512 = arith.constant 512 : index
    %c0_30 = arith.constant 0 : index
    %71 = vector.load %arg1[%c512, %c0_30] : memref<704x128xf32, #tpu.memory_space<vmem>>, vector<1x128xf32>
    %72 = arith.truncf %66 : vector<8x128xf32> to vector<8x128xbf16>
    %cst_31 = arith.constant dense<0.000000e+00> : vector<8x128xf32>
    %73 = tpu.matmul %72, %68, %cst_31 {dimension_numbers = #tpu.dot_dimension_numbers<[1], [0], [0], [1], [0, 0, 1, 1], [], []>} : vector<8x128xbf16>, vector<128x128xbf16>, vector<8x128xf32> -> vector<8x128xf32>
    %74 = vector.broadcast %71 : vector<1x128xf32> to vector<8x128xf32>
    %75 = arith.addf %73, %74 : vector<8x128xf32>
    %cst_32 = arith.constant 0.000000e+00 : f32
    %76 = vector.broadcast %cst_32 : f32 to vector<2x32xf32>
    %cst_33 = arith.constant 0.000000e+00 : f32
    %77 = vector.broadcast %cst_33 : f32 to vector<2x32xf32>
    %78 = vector.extract_strided_slice %75 {offsets = [0, 0], sizes = [2, 128], strides = [1, 1]} : vector<8x128xf32> to vector<2x128xf32>
    %79 = arith.truncf %76 : vector<2x32xf32> to vector<2x32xbf16>
    %cst_34 = arith.constant dense<0.000000e+00> : vector<2x128xf32>
    %80 = tpu.matmul %79, %70, %cst_34 {dimension_numbers = #tpu.dot_dimension_numbers<[1], [0], [0], [1], [0, 0, 1, 1], [], []>} : vector<2x32xbf16>, vector<32x128xbf16>, vector<2x128xf32> -> vector<2x128xf32>
    %81 = arith.addf %78, %80 : vector<2x128xf32>
    %82 = arith.negf %81 : vector<2x128xf32>
    %83 = math.exp %82 : vector<2x128xf32>
    %cst_35 = arith.constant 1.000000e+00 : f32
    %84 = vector.broadcast %cst_35 : f32 to vector<2x128xf32>
    %85 = arith.addf %84, %83 : vector<2x128xf32>
    %86 = arith.divf %84, %85 : vector<2x128xf32>
    %87 = vector.extract_strided_slice %81 {offsets = [0, 64], sizes = [2, 32], strides = [1, 1]} : vector<2x128xf32> to vector<2x32xf32>
    %88 = math.tanh %87 : vector<2x32xf32>
    %89 = vector.extract_strided_slice %86 {offsets = [0, 32], sizes = [2, 32], strides = [1, 1]} : vector<2x128xf32> to vector<2x32xf32>
    %90 = arith.mulf %89, %77 : vector<2x32xf32>
    %91 = vector.extract_strided_slice %86 {offsets = [0, 0], sizes = [2, 32], strides = [1, 1]} : vector<2x128xf32> to vector<2x32xf32>
    %92 = arith.mulf %91, %88 : vector<2x32xf32>
    %93 = arith.addf %90, %92 : vector<2x32xf32>
    %94 = vector.extract_strided_slice %86 {offsets = [0, 96], sizes = [2, 32], strides = [1, 1]} : vector<2x128xf32> to vector<2x32xf32>
    %95 = math.tanh %93 : vector<2x32xf32>
    %96 = arith.mulf %94, %95 : vector<2x32xf32>
    %c0_36 = arith.constant 0 : index
    %c0_37 = arith.constant 0 : index
    %97 = vector.load %arg3[%c0_36, %c0_37] : memref<8x32xf32, #tpu.memory_space<vmem>>, vector<2x32xf32>
    tpu.vector_store %arg3[%c0_36, %c0_37], %96 {strides = array<i32>} : memref<8x32xf32, #tpu.memory_space<vmem>>, vector<2x32xf32>,
    %98 = vector.extract_strided_slice %75 {offsets = [2, 0], sizes = [2, 128], strides = [1, 1]} : vector<8x128xf32> to vector<2x128xf32>
    %99 = arith.truncf %96 : vector<2x32xf32> to vector<2x32xbf16>
    %cst_38 = arith.constant dense<0.000000e+00> : vector<2x128xf32>
    %100 = tpu.matmul %99, %70, %cst_38 {dimension_numbers = #tpu.dot_dimension_numbers<[1], [0], [0], [1], [0, 0, 1, 1], [], []>} : vector<2x32xbf16>, vector<32x128xbf16>, vector<2x128xf32> -> vector<2x128xf32>
    %101 = arith.addf %98, %100 : vector<2x128xf32>
    %102 = arith.negf %101 : vector<2x128xf32>
    %103 = math.exp %102 : vector<2x128xf32>
    %cst_39 = arith.constant 1.000000e+00 : f32
    %104 = vector.broadcast %cst_39 : f32 to vector<2x128xf32>
    %105 = arith.addf %104, %103 : vector<2x128xf32>
    %106 = arith.divf %104, %105 : vector<2x128xf32>
    %107 = vector.extract_strided_slice %101 {offsets = [0, 64], sizes = [2, 32], strides = [1, 1]} : vector<2x128xf32> to vector<2x32xf32>
    %108 = math.tanh %107 : vector<2x32xf32>
    %109 = vector.extract_strided_slice %106 {offsets = [0, 32], sizes = [2, 32], strides = [1, 1]} : vector<2x128xf32> to vector<2x32xf32>
    %110 = arith.mulf %109, %93 : vector<2x32xf32>
    %111 = vector.extract_strided_slice %106 {offsets = [0, 0], sizes = [2, 32], strides = [1, 1]} : vector<2x128xf32> to vector<2x32xf32>
    %112 = arith.mulf %111, %108 : vector<2x32xf32>
    %113 = arith.addf %110, %112 : vector<2x32xf32>
    %114 = vector.extract_strided_slice %106 {offsets = [0, 96], sizes = [2, 32], strides = [1, 1]} : vector<2x128xf32> to vector<2x32xf32>
    %115 = math.tanh %113 : vector<2x32xf32>
    %116 = arith.mulf %114, %115 : vector<2x32xf32>
    %c2 = arith.constant 2 : index
    %c0_40 = arith.constant 0 : index
    %117 = vector.load %arg3[%c2, %c0_40] : memref<8x32xf32, #tpu.memory_space<vmem>>, vector<2x32xf32>
    tpu.vector_store %arg3[%c2, %c0_40], %116 {strides = array<i32>} : memref<8x32xf32, #tpu.memory_space<vmem>>, vector<2x32xf32>,
    %118 = vector.extract_strided_slice %75 {offsets = [4, 0], sizes = [2, 128], strides = [1, 1]} : vector<8x128xf32> to vector<2x128xf32>
    %119 = arith.truncf %116 : vector<2x32xf32> to vector<2x32xbf16>
    %cst_41 = arith.constant dense<0.000000e+00> : vector<2x128xf32>
    %120 = tpu.matmul %119, %70, %cst_41 {dimension_numbers = #tpu.dot_dimension_numbers<[1], [0], [0], [1], [0, 0, 1, 1], [], []>} : vector<2x32xbf16>, vector<32x128xbf16>, vector<2x128xf32> -> vector<2x128xf32>
    %121 = arith.addf %118, %120 : vector<2x128xf32>
    %122 = arith.negf %121 : vector<2x128xf32>
    %123 = math.exp %122 : vector<2x128xf32>
    %cst_42 = arith.constant 1.000000e+00 : f32
    %124 = vector.broadcast %cst_42 : f32 to vector<2x128xf32>
    %125 = arith.addf %124, %123 : vector<2x128xf32>
    %126 = arith.divf %124, %125 : vector<2x128xf32>
    %127 = vector.extract_strided_slice %121 {offsets = [0, 64], sizes = [2, 32], strides = [1, 1]} : vector<2x128xf32> to vector<2x32xf32>
    %128 = math.tanh %127 : vector<2x32xf32>
    %129 = vector.extract_strided_slice %126 {offsets = [0, 32], sizes = [2, 32], strides = [1, 1]} : vector<2x128xf32> to vector<2x32xf32>
    %130 = arith.mulf %129, %113 : vector<2x32xf32>
    %131 = vector.extract_strided_slice %126 {offsets = [0, 0], sizes = [2, 32], strides = [1, 1]} : vector<2x128xf32> to vector<2x32xf32>
    %132 = arith.mulf %131, %128 : vector<2x32xf32>
    %133 = arith.addf %130, %132 : vector<2x32xf32>
    %134 = vector.extract_strided_slice %126 {offsets = [0, 96], sizes = [2, 32], strides = [1, 1]} : vector<2x128xf32> to vector<2x32xf32>
    %135 = math.tanh %133 : vector<2x32xf32>
    %136 = arith.mulf %134, %135 : vector<2x32xf32>
    %c4 = arith.constant 4 : index
    %c0_43 = arith.constant 0 : index
    %137 = vector.load %arg3[%c4, %c0_43] : memref<8x32xf32, #tpu.memory_space<vmem>>, vector<2x32xf32>
    tpu.vector_store %arg3[%c4, %c0_43], %136 {strides = array<i32>} : memref<8x32xf32, #tpu.memory_space<vmem>>, vector<2x32xf32>,
    %138 = vector.extract_strided_slice %75 {offsets = [6, 0], sizes = [2, 128], strides = [1, 1]} : vector<8x128xf32> to vector<2x128xf32>
    %139 = arith.truncf %136 : vector<2x32xf32> to vector<2x32xbf16>
    %cst_44 = arith.constant dense<0.000000e+00> : vector<2x128xf32>
    %140 = tpu.matmul %139, %70, %cst_44 {dimension_numbers = #tpu.dot_dimension_numbers<[1], [0], [0], [1], [0, 0, 1, 1], [], []>} : vector<2x32xbf16>, vector<32x128xbf16>, vector<2x128xf32> -> vector<2x128xf32>
    %141 = arith.addf %138, %140 : vector<2x128xf32>
    %142 = arith.negf %141 : vector<2x128xf32>
    %143 = math.exp %142 : vector<2x128xf32>
    %cst_45 = arith.constant 1.000000e+00 : f32
    %144 = vector.broadcast %cst_45 : f32 to vector<2x128xf32>
    %145 = arith.addf %144, %143 : vector<2x128xf32>
    %146 = arith.divf %144, %145 : vector<2x128xf32>
    %147 = vector.extract_strided_slice %141 {offsets = [0, 64], sizes = [2, 32], strides = [1, 1]} : vector<2x128xf32> to vector<2x32xf32>
    %148 = math.tanh %147 : vector<2x32xf32>
    %149 = vector.extract_strided_slice %146 {offsets = [0, 32], sizes = [2, 32], strides = [1, 1]} : vector<2x128xf32> to vector<2x32xf32>
    %150 = arith.mulf %149, %133 : vector<2x32xf32>
    %151 = vector.extract_strided_slice %146 {offsets = [0, 0], sizes = [2, 32], strides = [1, 1]} : vector<2x128xf32> to vector<2x32xf32>
    %152 = arith.mulf %151, %148 : vector<2x32xf32>
    %153 = arith.addf %150, %152 : vector<2x32xf32>
    %154 = vector.extract_strided_slice %146 {offsets = [0, 96], sizes = [2, 32], strides = [1, 1]} : vector<2x128xf32> to vector<2x32xf32>
    %155 = math.tanh %153 : vector<2x32xf32>
    %156 = arith.mulf %154, %155 : vector<2x32xf32>
    %c6 = arith.constant 6 : index
    %c0_46 = arith.constant 0 : index
    %157 = vector.load %arg3[%c6, %c0_46] : memref<8x32xf32, #tpu.memory_space<vmem>>, vector<2x32xf32>
    tpu.vector_store %arg3[%c6, %c0_46], %156 {strides = array<i32>} : memref<8x32xf32, #tpu.memory_space<vmem>>, vector<2x32xf32>,
    %c520 = arith.constant 520 : index
    %c0_47 = arith.constant 0 : index
    %158 = vector.load %arg1[%c520, %c0_47] : memref<704x128xf32, #tpu.memory_space<vmem>>, vector<32x128xf32>
    %159 = arith.truncf %158 : vector<32x128xf32> to vector<32x128xbf16>
    %c552 = arith.constant 552 : index
    %c0_48 = arith.constant 0 : index
    %160 = vector.load %arg1[%c552, %c0_48] : memref<704x128xf32, #tpu.memory_space<vmem>>, vector<32x128xf32>
    %161 = arith.truncf %160 : vector<32x128xf32> to vector<32x128xbf16>
    %c584 = arith.constant 584 : index
    %c0_49 = arith.constant 0 : index
    %162 = vector.load %arg1[%c584, %c0_49] : memref<704x128xf32, #tpu.memory_space<vmem>>, vector<1x128xf32>
    %c0_50 = arith.constant 0 : index
    %c0_51 = arith.constant 0 : index
    %163 = vector.load %arg3[%c0_50, %c0_51] : memref<8x32xf32, #tpu.memory_space<vmem>>, vector<8x32xf32>
    %164 = arith.truncf %163 : vector<8x32xf32> to vector<8x32xbf16>
    %cst_52 = arith.constant dense<0.000000e+00> : vector<8x128xf32>
    %165 = tpu.matmul %164, %159, %cst_52 {dimension_numbers = #tpu.dot_dimension_numbers<[1], [0], [0], [1], [0, 0, 1, 1], [], []>} : vector<8x32xbf16>, vector<32x128xbf16>, vector<8x128xf32> -> vector<8x128xf32>
    %166 = vector.broadcast %162 : vector<1x128xf32> to vector<8x128xf32>
    %167 = arith.addf %165, %166 : vector<8x128xf32>
    %cst_53 = arith.constant 0.000000e+00 : f32
    %168 = vector.broadcast %cst_53 : f32 to vector<2x32xf32>
    %cst_54 = arith.constant 0.000000e+00 : f32
    %169 = vector.broadcast %cst_54 : f32 to vector<2x32xf32>
    %170 = vector.extract_strided_slice %167 {offsets = [0, 0], sizes = [2, 128], strides = [1, 1]} : vector<8x128xf32> to vector<2x128xf32>
    %171 = arith.truncf %168 : vector<2x32xf32> to vector<2x32xbf16>
    %cst_55 = arith.constant dense<0.000000e+00> : vector<2x128xf32>
    %172 = tpu.matmul %171, %161, %cst_55 {dimension_numbers = #tpu.dot_dimension_numbers<[1], [0], [0], [1], [0, 0, 1, 1], [], []>} : vector<2x32xbf16>, vector<32x128xbf16>, vector<2x128xf32> -> vector<2x128xf32>
    %173 = arith.addf %170, %172 : vector<2x128xf32>
    %174 = arith.negf %173 : vector<2x128xf32>
    %175 = math.exp %174 : vector<2x128xf32>
    %cst_56 = arith.constant 1.000000e+00 : f32
    %176 = vector.broadcast %cst_56 : f32 to vector<2x128xf32>
    %177 = arith.addf %176, %175 : vector<2x128xf32>
    %178 = arith.divf %176, %177 : vector<2x128xf32>
    %179 = vector.extract_strided_slice %173 {offsets = [0, 64], sizes = [2, 32], strides = [1, 1]} : vector<2x128xf32> to vector<2x32xf32>
    %180 = math.tanh %179 : vector<2x32xf32>
    %181 = vector.extract_strided_slice %178 {offsets = [0, 32], sizes = [2, 32], strides = [1, 1]} : vector<2x128xf32> to vector<2x32xf32>
    %182 = arith.mulf %181, %169 : vector<2x32xf32>
    %183 = vector.extract_strided_slice %178 {offsets = [0, 0], sizes = [2, 32], strides = [1, 1]} : vector<2x128xf32> to vector<2x32xf32>
    %184 = arith.mulf %183, %180 : vector<2x32xf32>
    %185 = arith.addf %182, %184 : vector<2x32xf32>
    %186 = vector.extract_strided_slice %178 {offsets = [0, 96], sizes = [2, 32], strides = [1, 1]} : vector<2x128xf32> to vector<2x32xf32>
    %187 = math.tanh %185 : vector<2x32xf32>
    %188 = arith.mulf %186, %187 : vector<2x32xf32>
    %189 = vector.extract_strided_slice %167 {offsets = [2, 0], sizes = [2, 128], strides = [1, 1]} : vector<8x128xf32> to vector<2x128xf32>
    %190 = arith.truncf %188 : vector<2x32xf32> to vector<2x32xbf16>
    %cst_57 = arith.constant dense<0.000000e+00> : vector<2x128xf32>
    %191 = tpu.matmul %190, %161, %cst_57 {dimension_numbers = #tpu.dot_dimension_numbers<[1], [0], [0], [1], [0, 0, 1, 1], [], []>} : vector<2x32xbf16>, vector<32x128xbf16>, vector<2x128xf32> -> vector<2x128xf32>
    %192 = arith.addf %189, %191 : vector<2x128xf32>
    %193 = arith.negf %192 : vector<2x128xf32>
    %194 = math.exp %193 : vector<2x128xf32>
    %cst_58 = arith.constant 1.000000e+00 : f32
    %195 = vector.broadcast %cst_58 : f32 to vector<2x128xf32>
    %196 = arith.addf %195, %194 : vector<2x128xf32>
    %197 = arith.divf %195, %196 : vector<2x128xf32>
    %198 = vector.extract_strided_slice %192 {offsets = [0, 64], sizes = [2, 32], strides = [1, 1]} : vector<2x128xf32> to vector<2x32xf32>
    %199 = math.tanh %198 : vector<2x32xf32>
    %200 = vector.extract_strided_slice %197 {offsets = [0, 32], sizes = [2, 32], strides = [1, 1]} : vector<2x128xf32> to vector<2x32xf32>
    %201 = arith.mulf %200, %185 : vector<2x32xf32>
    %202 = vector.extract_strided_slice %197 {offsets = [0, 0], sizes = [2, 32], strides = [1, 1]} : vector<2x128xf32> to vector<2x32xf32>
    %203 = arith.mulf %202, %199 : vector<2x32xf32>
    %204 = arith.addf %201, %203 : vector<2x32xf32>
    %205 = vector.extract_strided_slice %197 {offsets = [0, 96], sizes = [2, 32], strides = [1, 1]} : vector<2x128xf32> to vector<2x32xf32>
    %206 = math.tanh %204 : vector<2x32xf32>
    %207 = arith.mulf %205, %206 : vector<2x32xf32>
    %208 = vector.extract_strided_slice %167 {offsets = [4, 0], sizes = [2, 128], strides = [1, 1]} : vector<8x128xf32> to vector<2x128xf32>
    %209 = arith.truncf %207 : vector<2x32xf32> to vector<2x32xbf16>
    %cst_59 = arith.constant dense<0.000000e+00> : vector<2x128xf32>
    %210 = tpu.matmul %209, %161, %cst_59 {dimension_numbers = #tpu.dot_dimension_numbers<[1], [0], [0], [1], [0, 0, 1, 1], [], []>} : vector<2x32xbf16>, vector<32x128xbf16>, vector<2x128xf32> -> vector<2x128xf32>
    %211 = arith.addf %208, %210 : vector<2x128xf32>
    %212 = arith.negf %211 : vector<2x128xf32>
    %213 = math.exp %212 : vector<2x128xf32>
    %cst_60 = arith.constant 1.000000e+00 : f32
    %214 = vector.broadcast %cst_60 : f32 to vector<2x128xf32>
    %215 = arith.addf %214, %213 : vector<2x128xf32>
    %216 = arith.divf %214, %215 : vector<2x128xf32>
    %217 = vector.extract_strided_slice %211 {offsets = [0, 64], sizes = [2, 32], strides = [1, 1]} : vector<2x128xf32> to vector<2x32xf32>
    %218 = math.tanh %217 : vector<2x32xf32>
    %219 = vector.extract_strided_slice %216 {offsets = [0, 32], sizes = [2, 32], strides = [1, 1]} : vector<2x128xf32> to vector<2x32xf32>
    %220 = arith.mulf %219, %204 : vector<2x32xf32>
    %221 = vector.extract_strided_slice %216 {offsets = [0, 0], sizes = [2, 32], strides = [1, 1]} : vector<2x128xf32> to vector<2x32xf32>
    %222 = arith.mulf %221, %218 : vector<2x32xf32>
    %223 = arith.addf %220, %222 : vector<2x32xf32>
    %224 = vector.extract_strided_slice %216 {offsets = [0, 96], sizes = [2, 32], strides = [1, 1]} : vector<2x128xf32> to vector<2x32xf32>
    %225 = math.tanh %223 : vector<2x32xf32>
    %226 = arith.mulf %224, %225 : vector<2x32xf32>
    %227 = vector.extract_strided_slice %167 {offsets = [6, 0], sizes = [2, 128], strides = [1, 1]} : vector<8x128xf32> to vector<2x128xf32>
    %228 = arith.truncf %226 : vector<2x32xf32> to vector<2x32xbf16>
    %cst_61 = arith.constant dense<0.000000e+00> : vector<2x128xf32>
    %229 = tpu.matmul %228, %161, %cst_61 {dimension_numbers = #tpu.dot_dimension_numbers<[1], [0], [0], [1], [0, 0, 1, 1], [], []>} : vector<2x32xbf16>, vector<32x128xbf16>, vector<2x128xf32> -> vector<2x128xf32>
    %230 = arith.addf %227, %229 : vector<2x128xf32>
    %231 = arith.negf %230 : vector<2x128xf32>
    %232 = math.exp %231 : vector<2x128xf32>
    %cst_62 = arith.constant 1.000000e+00 : f32
    %233 = vector.broadcast %cst_62 : f32 to vector<2x128xf32>
    %234 = arith.addf %233, %232 : vector<2x128xf32>
    %235 = arith.divf %233, %234 : vector<2x128xf32>
    %236 = vector.extract_strided_slice %230 {offsets = [0, 64], sizes = [2, 32], strides = [1, 1]} : vector<2x128xf32> to vector<2x32xf32>
    %237 = math.tanh %236 : vector<2x32xf32>
    %238 = vector.extract_strided_slice %235 {offsets = [0, 32], sizes = [2, 32], strides = [1, 1]} : vector<2x128xf32> to vector<2x32xf32>
    %239 = arith.mulf %238, %223 : vector<2x32xf32>
    %240 = vector.extract_strided_slice %235 {offsets = [0, 0], sizes = [2, 32], strides = [1, 1]} : vector<2x128xf32> to vector<2x32xf32>
    %241 = arith.mulf %240, %237 : vector<2x32xf32>
    %242 = arith.addf %239, %241 : vector<2x32xf32>
    %243 = vector.extract_strided_slice %235 {offsets = [0, 96], sizes = [2, 32], strides = [1, 1]} : vector<2x128xf32> to vector<2x32xf32>
    %244 = math.tanh %242 : vector<2x32xf32>
    %245 = arith.mulf %243, %244 : vector<2x32xf32>
    %c592 = arith.constant 592 : index
    %c0_63 = arith.constant 0 : index
    %246 = vector.load %arg1[%c592, %c0_63] : memref<704x128xf32, #tpu.memory_space<vmem>>, vector<32x64xf32>
    %247 = arith.truncf %245 : vector<2x32xf32> to vector<2x32xbf16>
    %248 = arith.truncf %246 : vector<32x64xf32> to vector<32x64xbf16>
    %cst_64 = arith.constant dense<0.000000e+00> : vector<2x64xf32>
    %249 = tpu.matmul %247, %248, %cst_64 {dimension_numbers = #tpu.dot_dimension_numbers<[1], [0], [0], [1], [0, 0, 1, 1], [], []>} : vector<2x32xbf16>, vector<32x64xbf16>, vector<2x64xf32> -> vector<2x64xf32>
    %c624 = arith.constant 624 : index
    %c0_65 = arith.constant 0 : index
    %250 = vector.load %arg1[%c624, %c0_65] : memref<704x128xf32, #tpu.memory_space<vmem>>, vector<1x64xf32>
    %251 = vector.broadcast %250 : vector<1x64xf32> to vector<2x64xf32>
    %252 = arith.addf %249, %251 : vector<2x64xf32>
    %cst_66 = arith.constant 0.000000e+00 : f32
    %253 = vector.broadcast %cst_66 : f32 to vector<2x64xf32>
    %254 = arith.maximumf %252, %253 : vector<2x64xf32>
    %c632 = arith.constant 632 : index
    %c0_67 = arith.constant 0 : index
    %255 = vector.load %arg1[%c632, %c0_67] : memref<704x128xf32, #tpu.memory_space<vmem>>, vector<64x1xf32>
    %256 = arith.truncf %254 : vector<2x64xf32> to vector<2x64xbf16>
    %257 = arith.truncf %255 : vector<64x1xf32> to vector<64x1xbf16>
    %cst_68 = arith.constant dense<0.000000e+00> : vector<2x1xf32>
    %258 = tpu.matmul %256, %257, %cst_68 {dimension_numbers = #tpu.dot_dimension_numbers<[1], [0], [0], [1], [0, 0, 1, 1], [], []>} : vector<2x64xbf16>, vector<64x1xbf16>, vector<2x1xf32> -> vector<2x1xf32>
    %c696 = arith.constant 696 : index
    %c0_69 = arith.constant 0 : index
    %259 = vector.load %arg1[%c696, %c0_69] : memref<704x128xf32, #tpu.memory_space<vmem>>, vector<1x1xf32>
    %260 = vector.broadcast %259 : vector<1x1xf32> to vector<2x1xf32>
    %261 = arith.addf %258, %260 : vector<2x1xf32>
    %c0_70 = arith.constant 0 : index
    %c0_71 = arith.constant 0 : index
    %262 = vector.load %arg2[%c0_70, %c0_71] : memref<2x1xf32, #tpu.memory_space<vmem>>, vector<2x1xf32>
    tpu.vector_store %arg2[%c0_70, %c0_71], %261 {strides = array<i32>} : memref<2x1xf32, #tpu.memory_space<vmem>>, vector<2x1xf32>,
    return
  }
}

</mosaic_0001>

<bundles_post_ra>
// kernel: _fwd.1
= control target key start
LH: loop header
LB: loop body
LE: loop exit
PB: predicated region body
PF: predicated region fallthrough
CT: control target
= control target key end

     0   :  { %7 = vsyncpa [#allocation4], 0  ;;  %s1910_s9 = smov [#allocation3]   ;;  %s2191_s0 = inlined_call_operand.vmem [shape: f32[32,4], index: 0, kind: input, shape index: {}]   ;;  %s2192_s1 = inlined_call_operand.hbm [shape: f32[704,128], index: 1, kind: input, shape index: {}]   ;;  %s2193_s2 = inlined_call_operand.vmem [shape: f32[2,1], index: 2, kind: output, shape index: {}]  }
   0x1   :  { %s15_s10 = sshll.u32 %s1910_s9, 4  ;;  %s1886_s13 = scalar_lea.hbm %s2192_s1, 11264  ;;  %s16_s10 = int_to_ptr.vmem [resolvable:$true] %s15_s10 }
   0x2   :  { %p1887_p0 = scmp.ne.s32.totalorder %s2192_s1, %s1886_s13  ;;  %p1890_p1 = scmp.lt.u32.totalorder %s1886_s13, %s2192_s1 }
   0x4   :  { %p1892_p2 = pnand %p1890_p1, %p1887_p0 }
   0x6   :  { %1895 = shalt.err (!%p1892_p2)
}
   0x7   :  { %s1896_s18 = scalar_lea.vmem %s16_s10, 11264  ;;  %p1901_p4 = scmp.lt.s32.totalorder %s16_s10, %s16_s10 }
   0x8   :  { %p1897_p3 = scmp.ne.s32.totalorder %s16_s10, %s1896_s18  ;;  %p1902_p5 = scmp.lt.s32.totalorder %s1896_s18, %s1896_s18 }
   0xa   :  { %p1903_p6 = por %p1902_p5, %p1901_p4 }
   0xc   :  { %p1904_p7 = pnand %p1903_p6, %p1897_p3 }
   0xe   :  { %1907 = shalt.err (!%p1904_p7)
}
   0xf   :  { %s1911_s19 = smov 128   ;;  %s1912_s20 = smov 8  }
  0x10   :  { %21 = dma.hbm_to_vmem [thread:$0]  %s2192_s1, 11264, %s16_s10, [#allocation4], %s1911_s19, %s1911_s19, %s1912_s20  }
  0x11   :  { %1908 = dma.done.wait [#allocation4], 11264  }
  0x12   :  { %1909 = vsyncadd [#allocation4], 4294956032  ;;  %v1913_v0 = vmov 0   ;;  %v30_v1 = vld [vmem:[#allocation3 + $0x78] sm:$0xf]  ;;  %vm41_vm0 = vcmask 1041408   ;;  %v210_v41 = vlaneseq }
  0x13   :  { %1820 = vset.pattern.permute.xlu0 %v1913_v0  ;;  %1821 = vset.pattern.permute.xlu1 %v1913_v0  ;;  %v26_v2 = vld [vmem:[%s2191_s0] sm:$0xff]  ;;  %v27_v3 = vld [vmem:[%s2191_s0 + $0x8] sm:$0xff]  ;;  %vm34_vm1 = vcmask 31744   ;;  %v33_v4 = vpack.c.bf16 %v30_v1, %v30_v1  ;;  %v28_v6 = vld [vmem:[%s2191_s0 + $0x10] sm:$0xff]  ;;  %v1914_v28 = vmov 0.0   ;;  %vm1915_vm2 = vmmov 0  }
  0x14   :  { %v31_v5 = vpack.c.bf16 %v27_v3, %v26_v2  ;;  %v29_v7 = vld [vmem:[%s2191_s0 + $0x18] sm:$0xff]  ;;  %v94_v8 = vld [vmem:[#allocation3 + $0x80] sm:$0xf]  ;;  %v148_v10 = vld [vmem:[#allocation3 + $0x88] sm:$0xf]  ;;  %v1980_v42 = vshrl.u32 %v210_v41, 7 }
  0x15   :  { %v95_v9 = vpack.c.bf16 %v94_v8, %v94_v8  ;;  %1809 = vmatprep.subr.msk.bf16.mxu0 %vm41_vm0, %v33_v4  ;;  %v43_v11 = vsel %vm41_vm0, %v33_v4, 0  ;;  %v32_v12 = vpack.c.bf16 %v29_v7, %v28_v6  ;;  %v149_v13 = vpack.c.bf16 %v148_v10, %v148_v10  ;;  %v202_v14 = vld [vmem:[#allocation3] sm:$0xff]  ;;  %v204_v16 = vld [vmem:[#allocation3 + $0x10] sm:$0xff]  ;;  %v203_v18 = vld [vmem:[#allocation3 + $0x8] sm:$0xff]  ;;  %s1916_s0 = smov 64   ;;  %s1917_s30 = smov 32  }
  0x16   :  { %1631 = vmatprep.mubr.msk.bf16.mxu0 %vm34_vm1, %v31_v5  ;;  %1630 = vmatpush3.bf16.msra.mxu0 %v43_v11  ;;  %v245_v19 = vld [vmem:[#allocation3 + $0x20] sm:$0xff]  ;;  %v246_v20 = vld [vmem:[#allocation3 + $0x28] sm:$0xff]  ;;  %v247_v21 = vld [vmem:[#allocation3 + $0x30] sm:$0xff]  ;;  %vm212_vm3 = vcmp.lt.s32.totalorder %v1980_v42, 1  ;;  %vm253_vm4 = vcmp.lt.s32.totalorder %v1980_v42, 7  ;;  %vm316_vm5 = vcmask 261120  }
  0x17   :  { %1810 = vmatprep.subr.msk.bf16.mxu1 %vm41_vm0, %v95_v9  ;;  %v97_v15 = vsel %vm41_vm0, %v95_v9, 0  ;;  %1637 = vmatprep.mubr.msk.bf16.mxu1 %vm34_vm1, %v31_v5  ;;  %v151_v17 = vsel %vm41_vm0, %v149_v13, 0  ;;  %v205_v22 = vld [vmem:[#allocation3 + $0x18] sm:$0xff]  ;;  %v525_v24 = vld [vmem:[#allocation3 + $0x50] sm:$0xff]  ;;  %v545_v26 = vld [vmem:[#allocation3 + $0x60] sm:$0xff]  ;;  %vm374_vm6 = vcmask 523264  }
  0x18   :  { %1636 = vmatpush3.bf16.msra.mxu1 %v97_v15  ;;  %1811 = vmatprep.subr.msk.bf16.mxu0 %vm41_vm0, %v149_v13  ;;  %v248_v23 = vld [vmem:[#allocation3 + $0x38] sm:$0xff]  ;;  %v546_v27 = vld [vmem:[#allocation3 + $0x68] sm:$0xff]  ;;  %v362_v30 = vld [vmem:[#allocation3 + $0xa0] sm:$0xff]  ;;  %vm583_vm7 = vcmask 130048   ;;  %vm775_vm8 = vcmask 254976   ;;  %vm944_vm9 = vcmask 259076  }
  0x19   :  { %219 = vperm.xlu0 %1820, %v202_v14   ;;  %1632 = vmatmul.mubr.msk.bf16.vlgmr.msra.gmra.mrb[0].mxu0 %vm34_vm1, %v32_v12  ;;  %v526_v25 = vld [vmem:[#allocation3 + $0x58] sm:$0xff]  ;;  %v363_v32 = vld [vmem:[#allocation3 + $0xa8] sm:$0xff]  ;;  %v364_v33 = vld [vmem:[#allocation3 + $0xb0] sm:$0xff]  ;;  %vm859_vm10 = vcmask 257026   ;;  %vm1029_vm11 = vcmask 261126   ;;  %vm1515_vm12 = vcmask 1024  }
  0x1a   :  { %229 = vperm.xlu1 %1821, %v204_v16   ;;  %1642 = vmatpush3.bf16.msra.mxu0 %v151_v17  ;;  %v361_v29 = vld [vmem:[#allocation3 + $0x98] sm:$0xff]  ;;  %v371_v34 = vpack.c.bf16 %v364_v33, %v363_v32  ;;  %v366_v36 = vld [vmem:[#allocation3 + $0xc0] sm:$0xff] }
  0x1b   :  { %1638 = vmatmul.mubr.msk.bf16.vlgmr.msra.gmra.mrb[0].mxu1 %vm34_vm1, %v32_v12  ;;  %1643 = vmatprep.mubr.msk.bf16.mxu0 %vm34_vm1, %v31_v5  ;;  %v370_v31 = vpack.c.bf16 %v362_v30, %v361_v29  ;;  %v365_v35 = vld [vmem:[#allocation3 + $0xb8] sm:$0xff]  ;;  %v631_v42 = vld [vmem:[#allocation3 + $0x180] sm:$0xff] }
  0x1c   :  { %1647 = vmatprep.subr.bf16.mxu1 %v1914_v28  ;;  %1655 = vmatprep.subr.bf16.mxu0 %v1914_v28  ;;  %v372_v37 = vpack.c.bf16 %v366_v36, %v365_v35 }
  0x1d   :  { %224 = vperm.xlu0 %1820, %v203_v18   ;;  %1651 = vmatprep.mubr.msk.bf16.mxu1 %vm1915_vm2, %v1914_v28 }
  0x1e   :  { %260 = vperm.xlu1 %1821, %v245_v19  }
  0x21   :  { %265 = vperm.xlu0 %1820, %v246_v20   ;;  %1644 = vmatmul.mubr.msk.bf16.vlgmr.msra.gmra.mrb[4].mxu0 %vm34_vm1, %v32_v12 }
  0x22   :  { %270 = vperm.xlu1 %1821, %v247_v21   ;;  %1663 = vmatprep.mubr.msk.bf16.mxu0 %vm1915_vm2, %v1914_v28 }
  0x23   :  { %1656 = vmatpush3.bf16.msra.mxu0 %v370_v31 }
  0x24   :  { %1657 = vmatprep.subr.bf16.mxu0 %v1914_v28 }
  0x25   :  { %234 = vperm.xlu0 %1820, %v205_v22  }
  0x26   :  { %275 = vperm.xlu1 %1821, %v248_v23   ;;  %v1528_v23 = vld [vmem:[#allocation3 + $0x90] ss:$0 sm:$0xff] }
  0x27   :  { %1658 = vmatpush3.bf16.msra.mxu0 %v371_v34 }
  0x28   :  { %1659 = vmatprep.subr.bf16.mxu0 %v1914_v28 }
  0x29   :  { %533 = vperm.xlu0 %1820, %v525_v24  }
  0x2a   :  { %538 = vperm.xlu1 %1821, %v526_v25  }
  0x2b   :  { %1660 = vmatpush3.bf16.msra.mxu0 %v372_v37 }
  0x2c   :  { %1661 = vmatprep.subr.bf16.mxu0 %v1914_v28 }
  0x2d   :  { %553 = vperm.xlu0 %1820, %v545_v26  }
  0x2e   :  { %558 = vperm.xlu1 %1821, %v546_v27  }
  0x98   :  { %v220_v38 = vpop.permute.xlu0 %219 }
  0x99   :  { %v230_v40 = vpop.permute.xlu1 %229 }
  0x9c   :  { %v225_v39 = vpop.permute.xlu0 %224 }
  0x9d   :  { %v261_v44 = vpop.permute.xlu1 %260 }
  0xa0   :  { %v266_v43 = vpop.permute.xlu0 %265 }
  0xa1   :  { %v271_v1 = vpop.permute.xlu1 %270 }
  0xa4   :  { %v235_v57 = vpop.permute.xlu0 %234 }
  0xa5   :  { %v276_v16 = vpop.permute.xlu1 %275 }
  0xec   :  { %v1633_v45 = vpop.f32.mrb[0].mxu0 }
  0xed   :  { %v79_v46 = vpop.f32.mrb[1].mxu0  ;;  %v208_v51 = vrot.slane %v1633_v45, 7 }
  0xee   :  { %v1639_v47 = vpop.f32.mrb[0].mxu1  ;;  %v206_v48 = vrot.slane %v79_v46, 7  ;;  %v1634_v49 = vpop.f32.mrb[2].mxu0 }
  0xef   :  { %v133_v50 = vpop.f32.mrb[1].mxu1  ;;  %v209_v52 = vrot.slane %v1634_v49, 7  ;;  %v82_v53 = vpop.f32.mrb[3].mxu0 }
  0xf0   :  { %v1640_v54 = vpop.f32.mrb[2].mxu1  ;;  %v207_v55 = vrot.slane %v82_v53, 7 }
  0xf1   :  { %v136_v56 = vpop.f32.mrb[3].mxu1  ;;  %v216_v58 = vsel %vm212_vm3, %v209_v52, %v206_v48  ;;  %v213_v59 = vsel %vm212_vm3, %v208_v51, %v209_v52 }
  0xf2   :  { %v214_v60 = vsel %vm212_vm3, %v207_v55, %v208_v51  ;;  %v237_v61 = vmul.f32 %v220_v38, %v216_v58  ;;  %v240_v62 = vmul.f32 %v235_v57, %v213_v59  ;;  %v215_v63 = vsel %vm212_vm3, %v206_v48, %v207_v55  ;;  %v312_v55 = vld [vmem:[#allocation3 + $0x48] sm:$0xff]  ;;  %v420_v57 = vld [vmem:[#allocation3 + $0xe0] sm:$0xff] }
  0xf3   :  { %v239_v2 = vmul.f32 %v230_v40, %v214_v60  ;;  %v238_v3 = vmul.f32 %v225_v39, %v215_v63  ;;  %v421_v60 = vld [vmem:[#allocation3 + $0xe8] sm:$0xff]  ;;  %v423_v63 = vld [vmem:[#allocation3 + $0xf8] sm:$0xff] }
  0xf4   :  { %v241_v4 = vadd.f32 %v237_v61, %v133_v50  ;;  %v244_v5 = vadd.f32 %v1640_v54, %v240_v62  ;;  %v1645_v6 = vpop.f32.mrb[4].mxu0  ;;  %v311_v54 = vld [vmem:[#allocation3 + $0x40] sm:$0xff]  ;;  %v422_v61 = vld [vmem:[#allocation3 + $0xf0] sm:$0xff] }
  0xf5   :  { %v243_v7 = vadd.f32 %v1639_v47, %v239_v2  ;;  %v242_v8 = vadd.f32 %v238_v3, %v136_v56  ;;  %v187_v9 = vpop.f32.mrb[5].mxu0  ;;  %v251_v12 = vrot.slane %v1645_v6, 1  ;;  %v419_v56 = vld [vmem:[#allocation3 + $0xd8] sm:$0xff]  ;;  %v313_v58 = vpack.c.bf16 %v312_v55, %v311_v54  ;;  %v367_v3 = vld [vmem:[#allocation3 + $0xc8] sm:$0xff] }
  0xf6   :  { %v249_v10 = vrot.slane %v187_v9, 1  ;;  %v1646_v11 = vpop.f32.mrb[6].mxu0  ;;  %v427_v59 = vpack.c.bf16 %v420_v57, %v419_v56  ;;  %v428_v62 = vpack.c.bf16 %v422_v61, %v421_v60  ;;  %v425_v6 = vld [vmem:[#allocation3 + $0x108] sm:$0xff]  ;;  %v472_v9 = vld [vmem:[#allocation3 + $0x118] sm:$0xff] }
  0xf7   :  { %v252_v13 = vrot.slane %v1646_v11, 1  ;;  %v190_v14 = vpop.f32.mrb[7].mxu0  ;;  %v1533_v61 = vld [vmem:[#allocation3 + $0x158] ss:$0 sm:$0xff] }
  0xf8   :  { %v250_v15 = vrot.slane %v190_v14, 1 }
  0xf9   :  { %v254_v17 = vsel %vm253_vm4, %v251_v12, %v252_v13  ;;  %v257_v18 = vsel %vm253_vm4, %v252_v13, %v249_v10 }
  0xfa   :  { %v280_v19 = vmul.f32 %v271_v1, %v254_v17  ;;  %v281_v20 = vmul.f32 %v276_v16, %v257_v18  ;;  %v255_v21 = vsel %vm253_vm4, %v250_v15, %v251_v12  ;;  %v256_v22 = vsel %vm253_vm4, %v249_v10, %v250_v15  ;;  %v424_v1 = vld [vmem:[#allocation3 + $0x100] sm:$0xff]  ;;  %v474_v17 = vld [vmem:[#allocation3 + $0x128] sm:$0xff]  ;;  %v475_v18 = vld [vmem:[#allocation3 + $0x130] sm:$0xff] }
  0xfb   :  { %v278_v24 = vmul.f32 %v261_v44, %v256_v22  ;;  %v279_v25 = vmul.f32 %v266_v43, %v255_v21  ;;  %v429_v2 = vpack.c.bf16 %v424_v1, %v423_v63  ;;  %v473_v10 = vld [vmem:[#allocation3 + $0x120] sm:$0xff] }
  0xfc   :  { %v284_v26 = vadd.f32 %v280_v19, %v243_v7  ;;  %v285_v27 = vadd.f32 %v281_v20, %v244_v5  ;;  %v426_v7 = vld [vmem:[#allocation3 + $0x110] sm:$0xff]  ;;  %v480_v14 = vpack.c.bf16 %v473_v10, %v472_v9  ;;  %v481_v19 = vpack.c.bf16 %v475_v18, %v474_v17  ;;  %v476_v20 = vld [vmem:[#allocation3 + $0x138] sm:$0xff]  ;;  %v477_v21 = vld [vmem:[#allocation3 + $0x140] sm:$0xff] }
  0xfd   :  { %v282_v29 = vadd.f32 %v278_v24, %v241_v4  ;;  %v283_v30 = vadd.f32 %v279_v25, %v242_v8  ;;  %v368_v4 = vld [vmem:[#allocation3 + $0xd0] sm:$0xff]  ;;  %v430_v8 = vpack.c.bf16 %v426_v7, %v425_v6  ;;  %v482_v22 = vpack.c.bf16 %v477_v21, %v476_v20  ;;  %v630_v18 = vld [vmem:[#allocation3 + $0x178] sm:$0xff]  ;;  %v632_v20 = vld [vmem:[#allocation3 + $0x188] sm:$0xff] }
  0xfe   :  { %v293_v31 = vadd.f32 %v1528_v23, %v284_v26  ;;  %v294_v32 = vadd.f32 %v1528_v23, %v285_v27  ;;  %v373_v5 = vpack.c.bf16 %v368_v4, %v367_v3  ;;  %v479_v24 = vld [vmem:[#allocation3 + $0x150] sm:$0xff]  ;;  %v651_v26 = vld [vmem:[#allocation3 + $0x1e0] sm:$0xff]  ;;  %v652_v27 = vld [vmem:[#allocation3 + $0x1e8] sm:$0xff]  ;;  %v645_v21 = vpack.c.bf16 %v632_v20, %v631_v42 }
  0xff   :  { %v291_v33 = vadd.f32 %v1528_v23, %v282_v29  ;;  %v292_v34 = vadd.f32 %v1528_v23, %v283_v30  ;;  %v478_v23 = vld [vmem:[#allocation3 + $0x148] sm:$0xff]  ;;  %v2031_v29 = vpack.c.bf16 %v652_v27, %v651_v26  ;;  %v629_v17 = vld [vmem:[#allocation3 + $0x170] sm:$0xff] }
 0x100   :  { %v297_v35 = vmax.f32 %v293_v31, 0.0  ;;  %v298_v36 = vmax.f32 %v294_v32, 0.0  ;;  %1662 = vmatpush3.bf16.msra.mxu0 %v373_v5  ;;  %v483_v25 = vpack.c.bf16 %v479_v24, %v478_v23  ;;  %v634_v23 = vld [vmem:[#allocation3 + $0x198] sm:$0xff]  ;;  %v636_v26 = vld [vmem:[#allocation3 + $0x1a8] sm:$0xff] }
 0x101   :  { %v295_v37 = vmax.f32 %v291_v33, 0.0  ;;  %v296_v38 = vmax.f32 %v292_v34, 0.0  ;;  %1679 = vmatprep.subr.bf16.mxu0 %v1914_v28 }
 0x102   :  { %v301_v39 = vrot.slane %v297_v35, 1  ;;  %v302_v40 = vrot.slane %v298_v36, 1 }
 0x103   :  { %v299_v41 = vrot.slane %v295_v37, 1  ;;  %v300_v45 = vrot.slane %v296_v38, 1 }
 0x104   :  { %v303_v44 = vsel %vm253_vm4, %v301_v39, %v302_v40 }
 0x105   :  { %v304_v43 = vsel %vm253_vm4, %v300_v45, %v301_v39  ;;  %v305_v46 = vsel %vm253_vm4, %v299_v41, %v300_v45  ;;  %v306_v47 = vsel %vm253_vm4, %v302_v40, %v299_v41  ;;  %v309_v48 = vmax.f32 %v297_v35, %v303_v44  ;;  %v534_v40 = vpop.permute.xlu0 %533  ;;  %v539_v41 = vpop.permute.xlu1 %538 }
 0x106   :  { %v307_v49 = vmax.f32 %v295_v37, %v305_v46  ;;  %v308_v50 = vmax.f32 %v296_v38, %v304_v43  ;;  %v310_v51 = vmax.f32 %v298_v36, %v306_v47 }
 0x108   :  { %v314_v52 = vpack.c.bf16 %v308_v50, %v307_v49  ;;  %v315_v53 = vpack.c.bf16 %v310_v51, %v309_v48 }
 0x109   :  { %v554_v55 = vpop.permute.xlu0 %553  ;;  %v559_v56 = vpop.permute.xlu1 %558 }
 0x10a   :  { %1648 = vmatpush3.bf16.msra.mxu1 %v314_v52 }
 0x10b   :  { %1649 = vmatprep.subr.bf16.mxu1 %v1914_v28 }
 0x10e   :  { %1650 = vmatpush3.bf16.msra.mxu1 %v315_v53 }
 0x10f   :  { %1667 = vmatprep.subr.bf16.mxu1 %v1914_v28 }
 0x111   :  { %1652 = vmatmul.mubr.msk.bf16.vlgmr.msra.gmra.mrb[4].mxu1 %vm316_vm5, %v313_v58 }
 0x112   :  { %1668 = vmatpush3.bf16.msra.mxu1 %v427_v59  ;;  %1675 = vmatprep.mubr.msk.bf16.mxu1 %vm1915_vm2, %v1914_v28 }
 0x113   :  { %1669 = vmatprep.subr.bf16.mxu1 %v1914_v28 }
 0x116   :  { %1670 = vmatpush3.bf16.msra.mxu1 %v428_v62 }
 0x117   :  { %1671 = vmatprep.subr.bf16.mxu1 %v1914_v28 }
 0x11a   :  { %1672 = vmatpush3.bf16.msra.mxu1 %v429_v2 }
 0x11b   :  { %1673 = vmatprep.subr.bf16.mxu1 %v1914_v28 }
 0x11e   :  { %1674 = vmatpush3.bf16.msra.mxu1 %v430_v8 }
 0x11f   :  { %1691 = vmatprep.subr.bf16.mxu1 %v1914_v28 }
 0x1e4   :  { %v354_v11 = vpop.f32.mrb[4].mxu1 }
 0x1e5   :  { %v1653_v12 = vpop.f32.mrb[5].mxu1 }
 0x1e6   :  { %v357_v13 = vpop.f32.mrb[6].mxu1  ;;  %v627_v12 = vld [vmem:[#allocation3 + $0x160] sm:$0xff] }
 0x1e7   :  { %v369_v15 = vpack.c.bf16 %v357_v13, %v354_v11  ;;  %v1654_v16 = vpop.f32.mrb[7].mxu1  ;;  %v580_v11 = vld [vmem:[#allocation3 + $0x70] sm:$0xff]  ;;  %v628_v13 = vld [vmem:[#allocation3 + $0x168] sm:$0xff] }
 0x1e8   :  { %v643_v16 = vpack.c.bf16 %v628_v13, %v627_v12 }
 0x1e9   :  { %1664 = vmatmul.mubr.msk.bf16.vlgmr.msra.gmra.mrb[8].mxu0 %vm374_vm6, %v369_v15  ;;  %1676 = vmatmul.mubr.msk.bf16.vlgmr.msra.gmra.mrb[8].mxu1 %vm374_vm6, %v369_v15 }
 0x1ea   :  { %1680 = vmatpush3.bf16.msra.mxu0 %v480_v14  ;;  %1687 = vmatprep.mubr.msk.bf16.mxu0 %vm1915_vm2, %v1914_v28 }
 0x1eb   :  { %1681 = vmatprep.subr.bf16.mxu0 %v1914_v28  ;;  %1693 = vmatprep.mubr.msk.bf16.mxu1 %vm1915_vm2, %v1914_v28 }
 0x1ee   :  { %1682 = vmatpush3.bf16.msra.mxu0 %v481_v19  ;;  %v644_v19 = vpack.c.bf16 %v630_v18, %v629_v17 }
 0x1ef   :  { %1683 = vmatprep.subr.bf16.mxu0 %v1914_v28 }
 0x1f2   :  { %1684 = vmatpush3.bf16.msra.mxu0 %v482_v22  ;;  %v633_v22 = vld [vmem:[#allocation3 + $0x190] sm:$0xff] }
 0x1f3   :  { %1685 = vmatprep.subr.bf16.mxu0 %v1914_v28  ;;  %v646_v24 = vpack.c.bf16 %v634_v23, %v633_v22 }
 0x1f6   :  { %1686 = vmatpush3.bf16.msra.mxu0 %v483_v25  ;;  %v635_v25 = vld [vmem:[#allocation3 + $0x1a0] sm:$0xff] }
 0x1f7   :  { %1717 = vmatprep.subr.bf16.mxu0 %v1914_v28  ;;  %v647_v27 = vpack.c.bf16 %v636_v26, %v635_v25 }
 0x1f9   :  { %1688 = vmatmul.mubr.msk.bf16.vlgmr.msra.gmra.mrb[12].mxu0 %vm374_vm6, %v369_v15  ;;  %v581_v15 = vpack.c.bf16 %v580_v11, %v580_v11 }
 0x1fa   :  { %1721 = vmatprep.mubr.msk.bf16.mxu0 %vm1915_vm2, %v1914_v28  ;;  %1718 = vmatpush3.bf16.msra.mxu0 %v2031_v29 }
 0x1fb   :  { %1719 = vmatprep.subr.bf16.mxu0 %v1914_v28 }
 0x2bc   :  { %v412_v30 = vpop.f32.mrb[8].mxu0  ;;  %v465_v31 = vpop.f32.mrb[8].mxu1 }
 0x2bd   :  { %v1665_v32 = vpop.f32.mrb[9].mxu0  ;;  %v1677_v33 = vpop.f32.mrb[9].mxu1  ;;  %v527_v36 = vrot.slane %v412_v30, 7  ;;  %v637_v30 = vld [vmem:[#allocation3 + $0x1b0] sm:$0xff] }
 0x2be   :  { %v415_v34 = vpop.f32.mrb[10].mxu0  ;;  %v468_v35 = vpop.f32.mrb[10].mxu1  ;;  %v639_v33 = vld [vmem:[#allocation3 + $0x1c0] sm:$0xff] }
 0x2bf   :  { %v528_v37 = vrot.slane %v415_v34, 7  ;;  %v1666_v38 = vpop.f32.mrb[11].mxu0  ;;  %v1678_v39 = vpop.f32.mrb[11].mxu1  ;;  %v640_v34 = vld [vmem:[#allocation3 + $0x1c8] sm:$0xff] }
 0x2c0   :  { %v641_v38 = vld [vmem:[#allocation3 + $0x1d0] sm:$0xff]  ;;  %v642_v39 = vld [vmem:[#allocation3 + $0x1d8] sm:$0xff] }
 0x2c1   :  { %v530_v45 = vsel %vm212_vm3, %v528_v37, %v527_v36  ;;  %v529_v44 = vsel %vm212_vm3, %v527_v36, %v528_v37  ;;  %v653_v36 = vld [vmem:[#allocation3 + $0x1f0] sm:$0xff]  ;;  %v654_v37 = vld [vmem:[#allocation3 + $0x1f8] sm:$0xff] }
 0x2c2   :  { %v541_v43 = vmul.f32 %v534_v40, %v530_v45  ;;  %v542_v46 = vmul.f32 %v539_v41, %v529_v44  ;;  %v2057_v40 = vpack.c.bf16 %v654_v37, %v653_v36  ;;  %v650_v41 = vpack.c.bf16 %v642_v39, %v641_v38 }
 0x2c4   :  { %v543_v47 = vadd.f32 %v541_v43, %v465_v31  ;;  %v544_v48 = vadd.f32 %v542_v46, %v468_v35  ;;  %v638_v31 = vld [vmem:[#allocation3 + $0x1b8] sm:$0xff]  ;;  %v649_v35 = vpack.c.bf16 %v640_v34, %v639_v33  ;;  %1720 = vmatpush3.bf16.msra.mxu0 %v2057_v40 }
 0x2c5   :  { %v648_v32 = vpack.c.bf16 %v638_v31, %v637_v30  ;;  %1725 = vmatprep.subr.bf16.mxu0 %v1914_v28 }
 0x2c7   :  { %1722 = vmatmul.mubr.bf16.vlgmr.msra.gmra.mrb[16].mxu0 %v1913_v0 }
 0x2c8   :  { %1726 = vmatpush3.bf16.msra.mxu0 %v2031_v29  ;;  %1729 = vmatprep.mubr.msk.bf16.mxu0 %vm1915_vm2, %v1914_v28 }
 0x2c9   :  { %1727 = vmatprep.subr.bf16.mxu0 %v1914_v28 }
 0x2cc   :  { %v518_v49 = vpop.f32.mrb[12].mxu0  ;;  %1728 = vmatpush3.bf16.msra.mxu0 %v2057_v40 }
 0x2cd   :  { %v1689_v50 = vpop.f32.mrb[13].mxu0  ;;  %v547_v52 = vrot.slane %v518_v49, 1  ;;  %1733 = vmatprep.subr.bf16.mxu0 %v1914_v28 }
 0x2ce   :  { %v521_v51 = vpop.f32.mrb[14].mxu0 }
 0x2cf   :  { %v548_v53 = vrot.slane %v521_v51, 1  ;;  %v1690_v54 = vpop.f32.mrb[15].mxu0 }
 0x2d1   :  { %v549_v57 = vsel %vm253_vm4, %v547_v52, %v548_v53  ;;  %v550_v58 = vsel %vm253_vm4, %v548_v53, %v547_v52  ;;  %v1535_v52 = vld [vmem:[#allocation3 + $0x200] ss:$0 sm:$0xff] }
 0x2d2   :  { %v561_v59 = vmul.f32 %v554_v55, %v549_v57  ;;  %v562_v60 = vmul.f32 %v559_v56, %v550_v58 }
 0x2d4   :  { %v563_v62 = vadd.f32 %v561_v59, %v543_v47  ;;  %v564_v63 = vadd.f32 %v562_v60, %v544_v48 }
 0x2d6   :  { %v570_v1 = vadd.f32 %v1533_v61, %v563_v62  ;;  %v571_v2 = vadd.f32 %v1533_v61, %v564_v63 }
 0x2d8   :  { %v572_v3 = vmax.f32 %v570_v1, 0.0  ;;  %v573_v4 = vmax.f32 %v571_v2, 0.0 }
 0x2da   :  { %v574_v5 = vrot.slane %v572_v3, 1  ;;  %v575_v6 = vrot.slane %v573_v4, 1 }
 0x2dc   :  { %v576_v7 = vsel %vm253_vm4, %v574_v5, %v575_v6  ;;  %v577_v8 = vsel %vm253_vm4, %v575_v6, %v574_v5 }
 0x2dd   :  { %v578_v9 = vmax.f32 %v572_v3, %v576_v7  ;;  %v579_v10 = vmax.f32 %v573_v4, %v577_v8 }
 0x2df   :  { %v582_v14 = vpack.c.bf16 %v579_v10, %v578_v9 }
 0x2e1   :  { %1692 = vmatpush3.bf16.msra.mxu1 %v582_v14 }
 0x2e2   :  { %1697 = vmatprep.subr.bf16.mxu1 %v1914_v28 }
 0x2e4   :  { %1694 = vmatmul.mubr.msk.bf16.vlgmr.msra.gmra.mrb[12].mxu1 %vm583_vm7, %v581_v15 }
 0x2e5   :  { %1698 = vmatpush3.bf16.msra.mxu1 %v643_v16  ;;  %1713 = vmatprep.mubr.msk.bf16.mxu1 %vm1915_vm2, %v1914_v28 }
 0x2e6   :  { %1699 = vmatprep.subr.bf16.mxu1 %v1914_v28 }
 0x2e9   :  { %1700 = vmatpush3.bf16.msra.mxu1 %v644_v19 }
 0x2ea   :  { %1701 = vmatprep.subr.bf16.mxu1 %v1914_v28 }
 0x2ed   :  { %1702 = vmatpush3.bf16.msra.mxu1 %v645_v21 }
 0x2ee   :  { %1703 = vmatprep.subr.bf16.mxu1 %v1914_v28 }
 0x2f1   :  { %1704 = vmatpush3.bf16.msra.mxu1 %v646_v24 }
 0x2f2   :  { %1705 = vmatprep.subr.bf16.mxu1 %v1914_v28 }
 0x2f5   :  { %1706 = vmatpush3.bf16.msra.mxu1 %v647_v27 }
 0x2f6   :  { %1707 = vmatprep.subr.bf16.mxu1 %v1914_v28 }
 0x2f9   :  { %1708 = vmatpush3.bf16.msra.mxu1 %v648_v32 }
 0x2fa   :  { %1709 = vmatprep.subr.bf16.mxu1 %v1914_v28 }
 0x2fd   :  { %1710 = vmatpush3.bf16.msra.mxu1 %v649_v35 }
 0x2fe   :  { %1711 = vmatprep.subr.bf16.mxu1 %v1914_v28 }
 0x301   :  { %1712 = vmatpush3.bf16.msra.mxu1 %v650_v41 }
 0x302   :  { %1749 = vmatprep.subr.bf16.mxu1 %v1914_v28 }
 0x39a   :  { %v740_v48 = vpop.f32.mrb[16].mxu0 }
 0x39b   :  { %v1723_v49 = vpop.f32.mrb[17].mxu0 }
 0x39c   :  { %v743_v50 = vpop.f32.mrb[18].mxu0 }
 0x39d   :  { %v1724_v51 = vpop.f32.mrb[19].mxu0 }
 0x3b7   :  { %v621_v45 = vpop.f32.mrb[12].mxu1 }
 0x3b8   :  { %v658_v44 = vpack.c.bf16 %v621_v45, %v621_v45  ;;  %v1695_v43 = vpop.f32.mrb[13].mxu1 }
 0x3b9   :  { %v624_v46 = vpop.f32.mrb[14].mxu1 }
 0x3ba   :  { %1714 = vmatmul.mubr.bf16.vlgmr.msra.gmra.mrb[16].mxu1 %v658_v44  ;;  %v1696_v47 = vpop.f32.mrb[15].mxu1 }
 0x3bb   :  { %1753 = vmatprep.mubr.msk.bf16.mxu1 %vm1915_vm2, %v1914_v28 }
 0x48d   :  { %v697_v53 = vpop.f32.mrb[16].mxu1 }
 0x48e   :  { %v2071_v54 = vadd.f32 %v1535_v52, %v697_v53  ;;  %v1715_v55 = vpop.f32.mrb[17].mxu1 }
 0x48f   :  { %v700_v56 = vpop.f32.mrb[18].mxu1 }
 0x490   :  { %v746_v57 = vadd.f32 %v740_v48, %v2071_v54  ;;  %v1716_v58 = vpop.f32.mrb[19].mxu1 }
 0x492   :  { %1822 = vtanh.f32 %v746_v57  ;;  %v1536_v60 = vmul.f32 -1.442695, %v746_v57 }
 0x494   :  { %1824 = vpow2.f32 %v1536_v60 }
 0x49c   :  { %v1823_v59 = vpop.eup %1822 }
 0x49d   :  { %756 = vrot.lane.b32.xlu0 %v1823_v59, %s1916_s0 }
 0x49e   :  { %v1825_v61 = vpop.eup %1824 }
 0x49f   :  { %v750_v62 = vadd.f32 1.0, %v1825_v61 }
 0x4a1   :  { %1826 = vrcp.f32 %v750_v62 }
 0x4ab   :  { %v1827_v63 = vpop.eup %1826 }
 0x4ac   :  { %v754_v3 = vmul.f32 0.0, %v1827_v63 }
 0x50f   :  { %v757_v1 = vpop.permute.xlu0 %756 }
 0x510   :  { %v759_v2 = vmul.f32 %v1827_v63, %v757_v1 }
 0x512   :  { %761 = vrot.lane.b32.xlu1 %v759_v2, %s1917_s30 }
 0x584   :  { %v762_v4 = vpop.permute.xlu1 %761 }
 0x585   :  { %v764_v5 = vadd.f32 %v762_v4, %v754_v3 }
 0x587   :  { %1828 = vtanh.f32 %v764_v5  ;;  %v836_v23 = vrot.slane %v764_v5, 6 }
 0x591   :  { %v1829_v6 = vpop.eup %1828 }
 0x592   :  { %767 = vrot.lane.b32.xlu0 %v1829_v6, %s1916_s0 }
 0x604   :  { %v768_v7 = vpop.permute.xlu0 %767 }
 0x605   :  { %v2077_v8 = vmul.f32 %v1827_v63, %v768_v7 }
 0x607   :  { %v777_v9 = vpack.c.bf16 %v2077_v8, %v2077_v8 }
 0x609   :  { %779 = vrot.lane.b32.xlu1 %v777_v9, %s1917_s30 }
 0x67b   :  { %v780_v10 = vpop.permute.xlu1 %779 }
 0x67c   :  { %1730 = vmatmul.mubr.msk.bf16.vlgmr.msra.gmra.mrb[20].mxu0 %vm316_vm5, %v780_v10 }
 0x67d   :  { %1734 = vmatpush3.bf16.msra.mxu0 %v2031_v29  ;;  %1737 = vmatprep.mubr.msk.bf16.mxu0 %vm1915_vm2, %v1914_v28 }
 0x67e   :  { %1735 = vmatprep.subr.bf16.mxu0 %v1914_v28 }
 0x681   :  { %1736 = vmatpush3.bf16.msra.mxu0 %v2057_v40 }
 0x682   :  { %1741 = vmatprep.subr.bf16.mxu0 %v1914_v28 }
 0x74f   :  { %v818_v11 = vpop.f32.mrb[20].mxu0 }
 0x750   :  { %v825_v12 = vrot.slane %v818_v11, 6  ;;  %v1731_v13 = vpop.f32.mrb[21].mxu0 }
 0x751   :  { %v821_v14 = vpop.f32.mrb[22].mxu0 }
 0x752   :  { %v827_v15 = vadd.f32 %v825_v12, %v2071_v54  ;;  %v1732_v16 = vpop.f32.mrb[23].mxu0 }
 0x753   :  { %v1038_v16 = vld [vmem:[#allocation3 + $0x230] sm:$0xff] }
 0x754   :  { %1830 = vtanh.f32 %v827_v15  ;;  %v1538_v18 = vmul.f32 -1.442695, %v827_v15 }
 0x756   :  { %1832 = vpow2.f32 %v1538_v18  ;;  %v1032_v18 = vld [vmem:[#allocation3 + $0x210] sm:$0xff] }
 0x75e   :  { %v1831_v17 = vpop.eup %1830 }
 0x75f   :  { %840 = vrot.lane.b32.xlu0 %v1831_v17, %s1916_s0  ;;  %v1031_v17 = vld [vmem:[#allocation3 + $0x208] sm:$0xff] }
 0x760   :  { %v1833_v19 = vpop.eup %1832 }
 0x761   :  { %v831_v42 = vadd.f32 1.0, %v1833_v19 }
 0x763   :  { %1834 = vrcp.f32 %v831_v42  ;;  %v1033_v42 = vld [vmem:[#allocation3 + $0x218] sm:$0xff] }
 0x76d   :  { %v1835_v20 = vpop.eup %1834 }
 0x76e   :  { %v838_v24 = vmul.f32 %v1835_v20, %v836_v23  ;;  %v1040_v23 = vld [vmem:[#allocation3 + $0x240] sm:$0xff] }
 0x7d1   :  { %v841_v21 = vpop.permute.xlu0 %840 }
 0x7d2   :  { %v843_v22 = vmul.f32 %v1835_v20, %v841_v21  ;;  %v1034_v21 = vld [vmem:[#allocation3 + $0x220] sm:$0xff] }
 0x7d4   :  { %845 = vrot.lane.b32.xlu1 %v843_v22, %s1917_s30  ;;  %v1039_v22 = vld [vmem:[#allocation3 + $0x238] sm:$0xff] }
 0x846   :  { %v846_v25 = vpop.permute.xlu1 %845 }
 0x847   :  { %v848_v26 = vadd.f32 %v846_v25, %v838_v24  ;;  %v2125_v24 = vpack.c.bf16 %v1040_v23, %v1039_v22  ;;  %v1036_v25 = vpack.c.bf16 %v1034_v21, %v1033_v42 }
 0x849   :  { %1836 = vtanh.f32 %v848_v26  ;;  %v921_v48 = vrot.slane %v848_v26, 6 }
 0x853   :  { %v1837_v27 = vpop.eup %1836 }
 0x854   :  { %851 = vrot.lane.b32.xlu0 %v1837_v27, %s1916_s0 }
 0x8c6   :  { %v852_v30 = vpop.permute.xlu0 %851 }
 0x8c7   :  { %v2093_v31 = vmul.f32 %v1835_v20, %v852_v30  ;;  %v1035_v20 = vpack.c.bf16 %v1032_v18, %v1031_v17 }
 0x8c9   :  { %v861_v32 = vpack.c.bf16 %v2093_v31, %v2093_v31  ;;  %1750 = vmatpush3.bf16.msra.mxu1 %v1035_v20 }
 0x8ca   :  { %1751 = vmatprep.subr.bf16.mxu1 %v1914_v28 }
 0x8cb   :  { %v863_v33 = vrot.slane %v861_v32, 1 }
 0x8cd   :  { %864 = vrot.lane.b32.xlu1 %v863_v33, %s1917_s30  ;;  %1752 = vmatpush3.bf16.msra.mxu1 %v1036_v25 }
 0x8ce   :  { %1765 = vmatprep.subr.bf16.mxu1 %v1914_v28 }
 0x93f   :  { %v865_v34 = vpop.permute.xlu1 %864 }
 0x940   :  { %1738 = vmatmul.mubr.msk.bf16.vlgmr.msra.gmra.mrb[24].mxu0 %vm316_vm5, %v865_v34 }
 0x941   :  { %1742 = vmatpush3.bf16.msra.mxu0 %v2031_v29  ;;  %1745 = vmatprep.mubr.msk.bf16.mxu0 %vm1915_vm2, %v1914_v28 }
 0x942   :  { %1743 = vmatprep.subr.bf16.mxu0 %v1914_v28 }
 0x945   :  { %1744 = vmatpush3.bf16.msra.mxu0 %v2057_v40 }
 0x946   :  { %1757 = vmatprep.subr.bf16.mxu0 %v1914_v28 }
 0xa13   :  { %v903_v35 = vpop.f32.mrb[24].mxu0 }
 0xa14   :  { %v910_v36 = vrot.slane %v903_v35, 4  ;;  %v1739_v37 = vpop.f32.mrb[25].mxu0 }
 0xa15   :  { %v906_v38 = vpop.f32.mrb[26].mxu0  ;;  %v1543_v37 = vld [vmem:[#allocation3 + $0x248] ss:$0 sm:$0xff] }
 0xa16   :  { %v912_v39 = vadd.f32 %v910_v36, %v2071_v54  ;;  %v1740_v41 = vpop.f32.mrb[27].mxu0 }
 0xa18   :  { %1838 = vtanh.f32 %v912_v39  ;;  %v1540_v29 = vmul.f32 -1.442695, %v912_v39 }
 0xa1a   :  { %1840 = vpow2.f32 %v1540_v29 }
 0xa22   :  { %v1839_v45 = vpop.eup %1838 }
 0xa23   :  { %925 = vrot.lane.b32.xlu0 %v1839_v45, %s1916_s0 }
 0xa24   :  { %v1841_v44 = vpop.eup %1840 }
 0xa25   :  { %v916_v43 = vadd.f32 1.0, %v1841_v44 }
 0xa27   :  { %1842 = vrcp.f32 %v916_v43 }
 0xa31   :  { %v1843_v46 = vpop.eup %1842 }
 0xa32   :  { %v923_v49 = vmul.f32 %v1843_v46, %v921_v48 }
 0xa95   :  { %v926_v40 = vpop.permute.xlu0 %925 }
 0xa96   :  { %v928_v47 = vmul.f32 %v1843_v46, %v926_v40 }
 0xa98   :  { %930 = vrot.lane.b32.xlu1 %v928_v47, %s1917_s30 }
 0xb0a   :  { %v931_v50 = vpop.permute.xlu1 %930 }
 0xb0b   :  { %v933_v51 = vadd.f32 %v931_v50, %v923_v49 }
 0xb0d   :  { %1844 = vtanh.f32 %v933_v51 }
 0xb17   :  { %v1845_v52 = vpop.eup %1844 }
 0xb18   :  { %936 = vrot.lane.b32.xlu0 %v1845_v52, %s1916_s0 }
 0xb8a   :  { %v937_v53 = vpop.permute.xlu0 %936 }
 0xb8b   :  { %v939_v55 = vmul.f32 %v1843_v46, %v937_v53 }
 0xb8d   :  { %v946_v56 = vpack.c.bf16 %v939_v55, %v939_v55 }
 0xb8f   :  { %v948_v57 = vrot.slane %v946_v56, 2 }
 0xb91   :  { %949 = vrot.lane.b32.xlu1 %v948_v57, %s1917_s30 }
 0xc03   :  { %v950_v58 = vpop.permute.xlu1 %949 }
 0xc04   :  { %1746 = vmatmul.mubr.msk.bf16.vlgmr.msra.gmra.mrb[28].mxu0 %vm316_vm5, %v950_v58 }
 0xc05   :  { %1761 = vmatprep.mubr.msk.bf16.mxu0 %vm1915_vm2, %v1914_v28 }
 0xcd7   :  { %v988_v59 = vpop.f32.mrb[28].mxu0 }
 0xcd8   :  { %v995_v60 = vrot.slane %v988_v59, 2  ;;  %v1747_v61 = vpop.f32.mrb[29].mxu0 }
 0xcd9   :  { %v991_v62 = vpop.f32.mrb[30].mxu0 }
 0xcda   :  { %v997_v63 = vadd.f32 %v995_v60, %v2071_v54  ;;  %v1748_v1 = vpop.f32.mrb[31].mxu0  ;;  %v1006_v54 = vrot.slane %v933_v51, 6 }
 0xcdc   :  { %1846 = vtanh.f32 %v997_v63  ;;  %v1542_v3 = vmul.f32 -1.442695, %v997_v63 }
 0xcde   :  { %1848 = vpow2.f32 %v1542_v3 }
 0xce6   :  { %v1847_v2 = vpop.eup %1846 }
 0xce7   :  { %1010 = vrot.lane.b32.xlu0 %v1847_v2, %s1916_s0 }
 0xce8   :  { %v1849_v4 = vpop.eup %1848 }
 0xce9   :  { %v1001_v5 = vadd.f32 1.0, %v1849_v4 }
 0xceb   :  { %1850 = vrcp.f32 %v1001_v5 }
 0xcf5   :  { %v1851_v6 = vpop.eup %1850 }
 0xcf6   :  { %v1008_v10 = vmul.f32 %v1851_v6, %v1006_v54 }
 0xd59   :  { %v1011_v7 = vpop.permute.xlu0 %1010 }
 0xd5a   :  { %v1013_v9 = vmul.f32 %v1851_v6, %v1011_v7 }
 0xd5c   :  { %1015 = vrot.lane.b32.xlu1 %v1013_v9, %s1917_s30 }
 0xd60   :  { %772 = vrot.lane.b32.xlu1 %v2077_v8, %s1917_s30  ;;  %v1037_v8 = vld [vmem:[#allocation3 + $0x228] sm:$0xff] }
 0xd61   :  { %v2122_v19 = vpack.c.bf16 %v1038_v16, %v1037_v8 }
 0xd63   :  { %1758 = vmatpush3.bf16.msra.mxu0 %v2122_v19 }
 0xd64   :  { %941 = vrot.lane.b32.xlu1 %v939_v55, %s1917_s30  ;;  %1759 = vmatprep.subr.bf16.mxu0 %v1914_v28 }
 0xd67   :  { %1760 = vmatpush3.bf16.msra.mxu0 %v2125_v24 }
 0xd68   :  { %1773 = vmatprep.subr.bf16.mxu0 %v1914_v28 }
 0xd6a   :  { %1762 = vmatmul.mubr.bf16.vlgmr.msra.gmra.mrb[32].mxu0 %v1913_v0 }
 0xd6b   :  { %1774 = vmatpush3.bf16.msra.mxu0 %v2122_v19  ;;  %1777 = vmatprep.mubr.msk.bf16.mxu0 %vm1915_vm2, %v1914_v28 }
 0xd6c   :  { %1775 = vmatprep.subr.bf16.mxu0 %v1914_v28 }
 0xd6f   :  { %1776 = vmatpush3.bf16.msra.mxu0 %v2125_v24 }
 0xd70   :  { %1789 = vmatprep.subr.bf16.mxu0 %v1914_v28 }
 0xdce   :  { %v1016_v11 = vpop.permute.xlu1 %1015 }
 0xdcf   :  { %v1018_v12 = vadd.f32 %v1016_v11, %v1008_v10 }
 0xdd1   :  { %1852 = vtanh.f32 %v1018_v12 }
 0xdd2   :  { %v773_v13 = vpop.permute.xlu1 %772 }
 0xdd3   :  { %776 = vst.msk [vmem:[#allocation2] sm:$0x3] %vm775_vm8, %v773_v13 }
 0xdd6   :  { %v942_v14 = vpop.permute.xlu1 %941 }
 0xdd7   :  { %945 = vst.msk [vmem:[#allocation2] sm:$0x30] %vm944_vm9, %v942_v14 }
 0xddb   :  { %v1853_v15 = vpop.eup %1852 }
 0xddc   :  { %1021 = vrot.lane.b32.xlu0 %v1853_v15, %s1916_s0 }
 0xde0   :  { %856 = vrot.lane.b32.xlu0 %v2093_v31, %s1917_s30 }
 0xe3d   :  { %v1127_v33 = vpop.f32.mrb[32].mxu0 }
 0xe3e   :  { %v1763_v34 = vpop.f32.mrb[33].mxu0 }
 0xe3f   :  { %v1130_v35 = vpop.f32.mrb[34].mxu0 }
 0xe40   :  { %v1764_v36 = vpop.f32.mrb[35].mxu0 }
 0xe4e   :  { %v1022_v26 = vpop.permute.xlu0 %1021 }
 0xe4f   :  { %v1024_v27 = vmul.f32 %v1851_v6, %v1022_v26 }
 0xe51   :  { %1026 = vrot.lane.b32.xlu0 %v1024_v27, %s1917_s30 }
 0xe52   :  { %v857_v30 = vpop.permute.xlu0 %856 }
 0xe53   :  { %860 = vst.msk [vmem:[#allocation2] sm:$0xc] %vm859_vm10, %v857_v30 }
 0xec3   :  { %v1027_v0 = vpop.permute.xlu0 %1026 }
 0xec4   :  { %1030 = vst.msk [vmem:[#allocation2] sm:$0xc0] %vm1029_vm11, %v1027_v0 }
 0xecb   :  { %v1044_v31 = vld [vmem:[#allocation2] sm:$0xff] }
 0xecc   :  { %v1045_v32 = vpack.c.bf16 %v1044_v31, %v1044_v31 }
 0xece   :  { %1754 = vmatmul.mubr.msk.bf16.vlgmr.msra.gmra.mrb[20].mxu1 %vm316_vm5, %v1045_v32 }
 0xecf   :  { %1766 = vmatpush3.bf16.msra.mxu1 %v2122_v19  ;;  %1769 = vmatprep.mubr.msk.bf16.mxu1 %vm1915_vm2, %v1914_v28 }
 0xed0   :  { %1767 = vmatprep.subr.bf16.mxu1 %v1914_v28 }
 0xed3   :  { %1768 = vmatpush3.bf16.msra.mxu1 %v2125_v24 }
 0xed4   :  { %1781 = vmatprep.subr.bf16.mxu1 %v1914_v28 }
 0xfa1   :  { %v1087_v38 = vpop.f32.mrb[20].mxu1 }
 0xfa2   :  { %v2147_v39 = vadd.f32 %v1543_v37, %v1087_v38  ;;  %v1755_v41 = vpop.f32.mrb[21].mxu1 }
 0xfa3   :  { %v1090_v45 = vpop.f32.mrb[22].mxu1 }
 0xfa4   :  { %v1133_v29 = vadd.f32 %v1127_v33, %v2147_v39  ;;  %v1756_v44 = vpop.f32.mrb[23].mxu1 }
 0xfa6   :  { %1854 = vtanh.f32 %v1133_v29  ;;  %v1545_v46 = vmul.f32 -1.442695, %v1133_v29 }
 0xfa8   :  { %1856 = vpow2.f32 %v1545_v46 }
 0xfb0   :  { %v1855_v43 = vpop.eup %1854 }
 0xfb1   :  { %1143 = vrot.lane.b32.xlu1 %v1855_v43, %s1916_s0 }
 0xfb2   :  { %v1857_v40 = vpop.eup %1856 }
 0xfb3   :  { %v1137_v47 = vadd.f32 1.0, %v1857_v40 }
 0xfb5   :  { %1858 = vrcp.f32 %v1137_v47 }
 0xfbf   :  { %v1859_v48 = vpop.eup %1858 }
 0xfc0   :  { %v1141_v51 = vmul.f32 0.0, %v1859_v48 }
0x1023   :  { %v1144_v49 = vpop.permute.xlu1 %1143 }
0x1024   :  { %v1146_v50 = vmul.f32 %v1859_v48, %v1144_v49 }
0x1026   :  { %1148 = vrot.lane.b32.xlu0 %v1146_v50, %s1917_s30 }
0x1098   :  { %v1149_v52 = vpop.permute.xlu0 %1148 }
0x1099   :  { %v1151_v53 = vadd.f32 %v1149_v52, %v1141_v51 }
0x109b   :  { %1860 = vtanh.f32 %v1151_v53  ;;  %v1217_v10 = vrot.slane %v1151_v53, 6 }
0x10a5   :  { %v1861_v55 = vpop.eup %1860 }
0x10a6   :  { %1154 = vrot.lane.b32.xlu1 %v1861_v55, %s1916_s0 }
0x1118   :  { %v1155_v56 = vpop.permute.xlu1 %1154 }
0x1119   :  { %v1157_v57 = vmul.f32 %v1859_v48, %v1155_v56 }
0x111b   :  { %v1158_v58 = vpack.c.bf16 %v1157_v57, %v1157_v57 }
0x111d   :  { %1160 = vrot.lane.b32.xlu0 %v1158_v58, %s1917_s30 }
0x118f   :  { %v1161_v59 = vpop.permute.xlu0 %1160 }
0x1190   :  { %1770 = vmatmul.mubr.msk.bf16.vlgmr.msra.gmra.mrb[24].mxu1 %vm316_vm5, %v1161_v59 }
0x1191   :  { %1782 = vmatpush3.bf16.msra.mxu1 %v2122_v19  ;;  %1785 = vmatprep.mubr.msk.bf16.mxu1 %vm1915_vm2, %v1914_v28 }
0x1192   :  { %1783 = vmatprep.subr.bf16.mxu1 %v1914_v28 }
0x1195   :  { %1784 = vmatpush3.bf16.msra.mxu1 %v2125_v24 }
0x1196   :  { %1797 = vmatprep.subr.bf16.mxu1 %v1914_v28 }
0x1263   :  { %v1199_v60 = vpop.f32.mrb[24].mxu1 }
0x1264   :  { %v1206_v61 = vrot.slane %v1199_v60, 6  ;;  %v1771_v62 = vpop.f32.mrb[25].mxu1 }
0x1265   :  { %v1202_v63 = vpop.f32.mrb[26].mxu1  ;;  %v1396_v62 = vld [vmem:[#allocation3 + $0x260] sm:$0xff] }
0x1266   :  { %v1208_v1 = vadd.f32 %v1206_v61, %v2147_v39  ;;  %v1772_v2 = vpop.f32.mrb[27].mxu1  ;;  %v1395_v61 = vld [vmem:[#allocation3 + $0x258] sm:$0xff] }
0x1268   :  { %1862 = vtanh.f32 %v1208_v1  ;;  %v1547_v4 = vmul.f32 -1.442695, %v1208_v1  ;;  %v1397_v1 = vld [vmem:[#allocation3 + $0x268] sm:$0xff] }
0x1269   :  { %v1400_v2 = vpack.c.bf16 %v1397_v1, %v1396_v62 }
0x126a   :  { %1864 = vpow2.f32 %v1547_v4  ;;  %v1454_v4 = vld [vmem:[#allocation3 + $0x278] sm:$0xff] }
0x1272   :  { %v1863_v3 = vpop.eup %1862 }
0x1273   :  { %1221 = vrot.lane.b32.xlu1 %v1863_v3, %s1916_s0 }
0x1274   :  { %v1865_v5 = vpop.eup %1864 }
0x1275   :  { %v1212_v6 = vadd.f32 1.0, %v1865_v5  ;;  %v1455_v5 = vld [vmem:[#allocation3 + $0x280] sm:$0xff] }
0x1277   :  { %1866 = vrcp.f32 %v1212_v6  ;;  %v1456_v6 = vld [vmem:[#allocation3 + $0x288] sm:$0xff] }
0x1281   :  { %v1867_v7 = vpop.eup %1866 }
0x1282   :  { %v1219_v11 = vmul.f32 %v1867_v7, %v1217_v10 }
0x12e5   :  { %v1222_v9 = vpop.permute.xlu1 %1221 }
0x12e6   :  { %v1224_v54 = vmul.f32 %v1867_v7, %v1222_v9  ;;  %v1457_v9 = vld [vmem:[#allocation3 + $0x290] sm:$0xff] }
0x12e8   :  { %1226 = vrot.lane.b32.xlu0 %v1224_v54, %s1917_s30  ;;  %v1464_v54 = vpack.c.bf16 %v1457_v9, %v1456_v6 }
0x135a   :  { %v1227_v12 = vpop.permute.xlu0 %1226 }
0x135b   :  { %v1229_v13 = vadd.f32 %v1227_v12, %v1219_v11 }
0x135d   :  { %1868 = vtanh.f32 %v1229_v13  ;;  %v1296_v32 = vrot.slane %v1229_v13, 6 }
0x1367   :  { %v1869_v14 = vpop.eup %1868 }
0x1368   :  { %1232 = vrot.lane.b32.xlu1 %v1869_v14, %s1916_s0 }
0x13da   :  { %v1233_v15 = vpop.permute.xlu1 %1232 }
0x13db   :  { %v1235_v8 = vmul.f32 %v1867_v7, %v1233_v15  ;;  %v1463_v7 = vpack.c.bf16 %v1455_v5, %v1454_v4  ;;  %v1458_v15 = vld [vmem:[#allocation3 + $0x298] sm:$0xff] }
0x13dd   :  { %v1236_v16 = vpack.c.bf16 %v1235_v8, %v1235_v8  ;;  %v1459_v8 = vld [vmem:[#allocation3 + $0x2a0] sm:$0xff] }
0x13df   :  { %v1238_v17 = vrot.slane %v1236_v16, 1  ;;  %v1465_v16 = vpack.c.bf16 %v1459_v8, %v1458_v15 }
0x13e1   :  { %1239 = vrot.lane.b32.xlu0 %v1238_v17, %s1917_s30  ;;  %v1460_v17 = vld [vmem:[#allocation3 + $0x2a8] sm:$0xff] }
0x1453   :  { %v1240_v18 = vpop.permute.xlu0 %1239 }
0x1454   :  { %1778 = vmatmul.mubr.msk.bf16.vlgmr.msra.gmra.mrb[36].mxu0 %vm316_vm5, %v1240_v18  ;;  %v1461_v18 = vld [vmem:[#allocation3 + $0x2b0] sm:$0xff] }
0x1455   :  { %1793 = vmatprep.mubr.msk.bf16.mxu0 %vm1915_vm2, %v1914_v28 }
0x1527   :  { %v1278_v19 = vpop.f32.mrb[36].mxu0 }
0x1528   :  { %v1285_v42 = vrot.slane %v1278_v19, 4  ;;  %v1779_v20 = vpop.f32.mrb[37].mxu0  ;;  %v1466_v19 = vpack.c.bf16 %v1461_v18, %v1460_v17 }
0x1529   :  { %v1281_v21 = vpop.f32.mrb[38].mxu0 }
0x152a   :  { %v1287_v22 = vadd.f32 %v1285_v42, %v2147_v39  ;;  %v1780_v23 = vpop.f32.mrb[39].mxu0  ;;  %v1552_v42 = vld [vmem:[#allocation3 + $0x270] ss:$0 sm:$0xff] }
0x152c   :  { %1870 = vtanh.f32 %v1287_v22  ;;  %v1549_v25 = vmul.f32 -1.442695, %v1287_v22 }
0x152e   :  { %1872 = vpow2.f32 %v1549_v25 }
0x1536   :  { %v1871_v24 = vpop.eup %1870 }
0x1537   :  { %1300 = vrot.lane.b32.xlu1 %v1871_v24, %s1916_s0 }
0x1538   :  { %v1873_v26 = vpop.eup %1872 }
0x1539   :  { %v1291_v27 = vadd.f32 1.0, %v1873_v26 }
0x153b   :  { %1874 = vrcp.f32 %v1291_v27  ;;  %v1554_v27 = vld [vmem:[#allocation3 + $0x2b8] ss:$0 sm:$0xff] }
0x1545   :  { %v1875_v30 = vpop.eup %1874 }
0x1546   :  { %v1298_v33 = vmul.f32 %v1875_v30, %v1296_v32 }
0x15a9   :  { %v1301_v0 = vpop.permute.xlu1 %1300 }
0x15aa   :  { %v1303_v31 = vmul.f32 %v1875_v30, %v1301_v0 }
0x15ac   :  { %1305 = vrot.lane.b32.xlu0 %v1303_v31, %s1917_s30 }
0x161e   :  { %v1306_v34 = vpop.permute.xlu0 %1305 }
0x161f   :  { %v1308_v35 = vadd.f32 %v1306_v34, %v1298_v33 }
0x1621   :  { %1876 = vtanh.f32 %v1308_v35  ;;  %v1375_v57 = vrot.slane %v1308_v35, 6 }
0x162b   :  { %v1877_v36 = vpop.eup %1876 }
0x162c   :  { %1311 = vrot.lane.b32.xlu1 %v1877_v36, %s1916_s0 }
0x169e   :  { %v1312_v37 = vpop.permute.xlu1 %1311 }
0x169f   :  { %v1314_v38 = vmul.f32 %v1875_v30, %v1312_v37 }
0x16a1   :  { %v1315_v41 = vpack.c.bf16 %v1314_v38, %v1314_v38 }
0x16a3   :  { %v1317_v45 = vrot.slane %v1315_v41, 2 }
0x16a5   :  { %1318 = vrot.lane.b32.xlu0 %v1317_v45, %s1917_s30 }
0x1717   :  { %v1319_v29 = vpop.permute.xlu0 %1318 }
0x1718   :  { %1786 = vmatmul.mubr.msk.bf16.vlgmr.msra.gmra.mrb[28].mxu1 %vm316_vm5, %v1319_v29 }
0x1719   :  { %1805 = vmatprep.mubr.msk.bf16.mxu1 %vm1915_vm2, %v1914_v28  ;;  %1798 = vmatpush3.bf16.msra.mxu1 %v1463_v7 }
0x171a   :  { %1799 = vmatprep.subr.bf16.mxu1 %v1914_v28 }
0x171d   :  { %1800 = vmatpush3.bf16.msra.mxu1 %v1464_v54 }
0x171e   :  { %1801 = vmatprep.subr.bf16.mxu1 %v1914_v28 }
0x1721   :  { %1802 = vmatpush3.bf16.msra.mxu1 %v1465_v16 }
0x1722   :  { %1803 = vmatprep.subr.bf16.mxu1 %v1914_v28 }
0x1725   :  { %1804 = vmatpush3.bf16.msra.mxu1 %v1466_v19 }
0x17eb   :  { %v1357_v44 = vpop.f32.mrb[28].mxu1 }
0x17ec   :  { %v1364_v43 = vrot.slane %v1357_v44, 2  ;;  %v1787_v46 = vpop.f32.mrb[29].mxu1 }
0x17ed   :  { %v1360_v40 = vpop.f32.mrb[30].mxu1 }
0x17ee   :  { %v1366_v47 = vadd.f32 %v1364_v43, %v2147_v39  ;;  %v1788_v48 = vpop.f32.mrb[31].mxu1  ;;  %v1394_v39 = vld [vmem:[#allocation3 + $0x250] sm:$0xff] }
0x17ef   :  { %v1399_v63 = vpack.c.bf16 %v1395_v61, %v1394_v39 }
0x17f0   :  { %1878 = vtanh.f32 %v1366_v47  ;;  %v1551_v50 = vmul.f32 -1.442695, %v1366_v47 }
0x17f1   :  { %1790 = vmatpush3.bf16.msra.mxu0 %v1399_v63 }
0x17f2   :  { %1880 = vpow2.f32 %v1551_v50  ;;  %1791 = vmatprep.subr.bf16.mxu0 %v1914_v28 }
0x17f5   :  { %1792 = vmatpush3.bf16.msra.mxu0 %v1400_v2 }
0x17fa   :  { %v1879_v49 = vpop.eup %1878 }
0x17fb   :  { %1379 = vrot.lane.b32.xlu1 %v1879_v49, %s1916_s0 }
0x17fc   :  { %v1881_v51 = vpop.eup %1880 }
0x17fd   :  { %v1370_v52 = vadd.f32 1.0, %v1881_v51 }
0x17ff   :  { %1882 = vrcp.f32 %v1370_v52 }
0x1809   :  { %v1883_v53 = vpop.eup %1882 }
0x180a   :  { %v1377_v58 = vmul.f32 %v1883_v53, %v1375_v57 }
0x186d   :  { %v1380_v55 = vpop.permute.xlu1 %1379 }
0x186e   :  { %v1382_v56 = vmul.f32 %v1883_v53, %v1380_v55 }
0x1870   :  { %1384 = vrot.lane.b32.xlu0 %v1382_v56, %s1917_s30 }
0x18e2   :  { %v1385_v59 = vpop.permute.xlu0 %1384 }
0x18e3   :  { %v1387_v60 = vadd.f32 %v1385_v59, %v1377_v58 }
0x18e5   :  { %1884 = vtanh.f32 %v1387_v60 }
0x18ef   :  { %v1885_v3 = vpop.eup %1884 }
0x18f0   :  { %1390 = vrot.lane.b32.xlu1 %v1885_v3, %s1916_s0 }
0x1962   :  { %v1391_v10 = vpop.permute.xlu1 %1390 }
0x1963   :  { %v1393_v11 = vmul.f32 %v1883_v53, %v1391_v10 }
0x1965   :  { %v1398_v12 = vpack.c.bf16 %v1393_v11, %v1393_v11 }
0x1967   :  { %v1407_v13 = vrot.slane %v1398_v12, 3 }
0x1969   :  { %1408 = vrot.lane.b32.xlu0 %v1407_v13, %s1917_s30 }
0x19db   :  { %v1409_v14 = vpop.permute.xlu0 %1408 }
0x19dc   :  { %1794 = vmatmul.mubr.msk.bf16.vlgmr.msra.gmra.mrb[40].mxu0 %vm316_vm5, %v1409_v14 }
0x1aaf   :  { %v1447_v20 = vpop.f32.mrb[40].mxu0 }
0x1ab0   :  { %v1448_v21 = vadd.f32 %v1552_v42, %v1447_v20  ;;  %v1795_v22 = vpop.f32.mrb[41].mxu0 }
0x1ab1   :  { %v1450_v23 = vpop.f32.mrb[42].mxu0 }
0x1ab2   :  { %v1453_v24 = vmax.f32 %v1448_v21, 0.0  ;;  %v1796_v25 = vpop.f32.mrb[43].mxu0 }
0x1ab4   :  { %v1462_v26 = vpack.c.bf16 %v1453_v24, %v1453_v24 }
0x1ab6   :  { %1806 = vmatmul.mubr.msk.bf16.vlgmr.msra.gmra.mrb[32].mxu1 %vm374_vm6, %v1462_v26 }
0x1b89   :  { %v1509_v30 = vpop.f32.mrb[32].mxu1 }
0x1b8a   :  { %v1510_v0 = vadd.f32 %v1554_v27, %v1509_v30  ;;  %v1807_v31 = vpop.f32.mrb[33].mxu1 }
0x1b8b   :  { %v1512_v28 = vpop.f32.mrb[34].mxu1 }
0x1b8c   :  { %1516 = vst.msk [vmem:[%s2193_s2] sm:$0x3] %vm1515_vm12, %v1510_v0  ;;  %v1808_v32 = vpop.f32.mrb[35].mxu1 }
0x1b8d   :  { %1521 = vsyncpa [#allocation4], 1 }

</bundles_post_ra>
